<compile_context>
chip_gen: v6e
topology: v6e:2x2x1
jax: 0.10.0
libtpu: 0.0.40
codegen_flags: <defaults>
</compile_context>

<pallas_src>
import math
from typing import NamedTuple

import jax
import jax.numpy as jnp
from jax.experimental import pallas as pl
from jax.experimental.pallas import tpu as pltpu


class EncoderContext(NamedTuple):
    decoder_hidden: jnp.ndarray
    decoder_input_concat: jnp.ndarray
    decoder_hidden_concat: jnp.ndarray


def _round_up(x, m):
    return (x + m - 1) // m * m


# ----------------------------------------------------------------------------
# Fused kernel: hoisted input projection + GRU recurrence + counters epilogue.
# ----------------------------------------------------------------------------
def _fused_encoder_kernel(x_ref, len_ref,
                          w_i_ref, b_i_ref, w_h_ref, b_h_ref,
                          built_ref, w_cb_ref, b_cb_ref,
                          target_ref, w_ct_ref, b_ct_ref,
                          h_out_ref, cnt_out_ref,
                          xproj):
    Bp, HP = h_out_ref.shape            # padded batch (x8), padded hidden (x128)
    T = x_ref.shape[0] // Bp            # static trip count

    # ---- hoisted input projection: one (T*Bp, D) @ (D, 3*HP) matmul ----------
    xproj[...] = (jnp.dot(x_ref[...], w_i_ref[...],
                          preferred_element_type=jnp.float32)
                  + b_i_ref[...])

    len_col = len_ref[...]              # (Bp, 1) int32, loaded once

    # ---- GRU recurrence: time loop in-kernel, h resident in vregs ------------
    def step(t, h):
        row0 = pl.multiple_of(t * Bp, Bp)
        gx = xproj[pl.ds(row0, Bp), :]                                  # (Bp, 3*HP)
        gh = (jnp.dot(h, w_h_ref[...], preferred_element_type=jnp.float32)
              + b_h_ref[...])                                           # (Bp, 3*HP)
        r = jax.nn.sigmoid(gx[:, :HP] + gh[:, :HP])
        z = jax.nn.sigmoid(gx[:, HP:2 * HP] + gh[:, HP:2 * HP])
        # b_hn stays inside the r*() term (PyTorch GRU equations).
        n = jnp.tanh(gx[:, 2 * HP:] + r * gh[:, 2 * HP:])
        h_new = (1.0 - z) * n + z * h
        # pack_padded_sequence semantics: freeze hidden once t >= length[b].
        return jnp.where(t < len_col, h_new, h)

    h_last = jax.lax.fori_loop(0, T, step,
                               jnp.zeros((Bp, HP), jnp.float32),
                               unroll=(T <= 16))
    h_out_ref[...] = h_last

    # ---- block-counters epilogue (fused; no second pallas_call) --------------
    E = w_cb_ref.shape[1]
    eb = (jnp.dot(built_ref[...], w_cb_ref[...],
                  preferred_element_type=jnp.float32) + b_cb_ref[...])
    et = (jnp.dot(target_ref[...], w_ct_ref[...],
                  preferred_element_type=jnp.float32) + b_ct_ref[...])
    cnt_out_ref[:, :E] = jnp.maximum(eb, 0.0)   # ReLU nonlinearity
    cnt_out_ref[:, E:] = jnp.maximum(et, 0.0)


# ----------------------------------------------------------------------------
# Parameter packing helpers (gate-concat + lane padding).
# ----------------------------------------------------------------------------
def _pack_gates(wr, wz, wn, rows_pad, cols_pad):
    """Pack per-gate (rows, H) blocks into one zero-padded (rows_pad, 3*cols_pad)."""
    H = wr.shape[1]

    def one(w):
        return jnp.pad(w, ((0, rows_pad - w.shape[0]), (0, cols_pad - H)))

    return jnp.concatenate([one(wr), one(wz), one(wn)], axis=1)


# ----------------------------------------------------------------------------
# Full module forward.
# ----------------------------------------------------------------------------
def utterances_and_block_counters_encoder(encoder_inputs, params):
    rnn = params["rnn"]
    cnt = params["counters"]

    tokens = encoder_inputs["prev_utterances"]        # (B, T) int32
    lengths = encoder_inputs["lengths"]               # (B,)   int32
    built = encoder_inputs["built_counters"]          # (B, 6)
    target = encoder_inputs["target_counters"]        # (B, 6)

    B, T = tokens.shape
    D = rnn["embedding"].shape[1]
    H = rnn["w_hr"].shape[0]
    E = cnt["wb"].shape[1]
    HP = _round_up(H, 128)                            # lane-dense hidden
    Bp = _round_up(B, 8)                              # sublane-aligned batch

    # --- XLA glue: embedding lookup, time-major layout, batch padding --------
    # TODO(synk): move the embedding gather in-kernel (VMEM-resident table)
    # once dynamic row-gather lowering is relied upon for all target chips.
    emb = jnp.take(rnn["embedding"], tokens, axis=0).astype(jnp.float32)  # (B,T,D)
    x_tbd = jnp.transpose(emb, (1, 0, 2))                                 # (T,B,D)
    x_tbd = jnp.pad(x_tbd, ((0, 0), (0, Bp - B), (0, 0)))
    x_flat = x_tbd.reshape(T * Bp, D)                                     # (T*Bp, D)

    len_col = jnp.pad(lengths.astype(jnp.int32), (0, Bp - B)).reshape(Bp, 1)
    built_p = jnp.pad(built.astype(jnp.float32), ((0, Bp - B), (0, 0)))
    target_p = jnp.pad(target.astype(jnp.float32), ((0, Bp - B), (0, 0)))

    # --- gate-packed, lane-padded GRU weights (tiny; folded by XLA under jit) -
    w_i = _pack_gates(rnn["w_ir"], rnn["w_iz"], rnn["w_in"], D, HP)       # (D, 3HP)
    b_i = _pack_gates(rnn["b_ir"], rnn["b_iz"], rnn["b_in"], 1, HP)       # (1, 3HP)
    w_h = _pack_gates(rnn["w_hr"], rnn["w_hz"], rnn["w_hn"], HP, HP)      # (HP, 3HP)
    b_h = _pack_gates(rnn["b_hr"], rnn["b_hz"], rnn["b_hn"], 1, HP)       # (1, 3HP)

    h_pad, cnt_out = pl.pallas_call(
        _fused_encoder_kernel,
        out_shape=(jax.ShapeDtypeStruct((Bp, HP), jnp.float32),
                   jax.ShapeDtypeStruct((Bp, 2 * E), jnp.float32)),
        scratch_shapes=[pltpu.VMEM((T * Bp, 3 * HP), jnp.float32)],
    )(x_flat, len_col, w_i, b_i, w_h, b_h,
      built_p, cnt["wb"], cnt["bb"], target_p, cnt["wt"], cnt["bt"])

    h_last = h_pad[:B, :H]                            # strip lane / batch padding
    rnn_hidden = h_last[None, :, :]                   # (num_layers=1, B, H)
    block_counters_encoding = cnt_out[:B]             # (B, 2E)

    # TODO(synk): num_encoder_hidden_layers > 1, bidirectional GRU and the
    # optional encoder linear projection are not reconstructed (single-layer
    # unidirectional GRU used).
    return EncoderContext(decoder_hidden=rnn_hidden,
                          decoder_input_concat=block_counters_encoding,
                          decoder_hidden_concat=block_counters_encoding)


# ----------------------------------------------------------------------------
# Deterministic parameter init (PyTorch-style uniform ranges).
# ----------------------------------------------------------------------------
def init_params(key, vocab_size, emb_dim, hidden, counter_emb):
    keys = jax.random.split(key, 20)

    def u(k, shape, scale):
        return jax.random.uniform(k, shape, jnp.float32, -scale, scale)

    sc = 1.0 / math.sqrt(6.0)      # counters linear layers fan_in = 6
    sh = 1.0 / math.sqrt(hidden)   # GRU init range

    counters = {
        "wb": u(keys[0], (6, counter_emb), sc),
        "bb": u(keys[1], (1, counter_emb), sc),
        "wt": u(keys[2], (6, counter_emb), sc),
        "bt": u(keys[3], (1, counter_emb), sc),
    }
    rnn = {
        "embedding": jax.random.normal(keys[4], (vocab_size, emb_dim), jnp.float32),
        "w_ir": u(keys[5], (emb_dim, hidden), sh),
        "w_iz": u(keys[6], (emb_dim, hidden), sh),
        "w_in": u(keys[7], (emb_dim, hidden), sh),
        "w_hr": u(keys[8], (hidden, hidden), sh),
        "w_hz": u(keys[9], (hidden, hidden), sh),
        "w_hn": u(keys[10], (hidden, hidden), sh),
        "b_ir": u(keys[11], (1, hidden), sh),
        "b_iz": u(keys[12], (1, hidden), sh),
        "b_in": u(keys[13], (1, hidden), sh),
        "b_hr": u(keys[14], (1, hidden), sh),
        "b_hz": u(keys[15], (1, hidden), sh),
        "b_hn": u(keys[16], (1, hidden), sh),
    }
    return {"counters": counters, "rnn": rnn}


if __name__ == "__main__":
    B, T, V, D, H, E = 8, 8, 50, 32, 32, 16

    key = jax.random.PRNGKey(0)
    k_tok, k_len, k_built, k_tgt = jax.random.split(key, 4)
    encoder_inputs = {
        "prev_utterances": jax.random.randint(k_tok, (B, T), 0, V, dtype=jnp.int32),
        "lengths": jax.random.randint(k_len, (B,), 1, T + 1, dtype=jnp.int32),
        "built_counters": jax.random.randint(k_built, (B, 6), 0, 10).astype(jnp.float32),
        "target_counters": jax.random.randint(k_tgt, (B, 6), 0, 10).astype(jnp.float32),
    }

    params = init_params(jax.random.PRNGKey(42), V, D, H, E)

    out = utterances_and_block_counters_encoder(encoder_inputs, params)
    out = jax.tree_util.tree_map(lambda a: jax.block_until_ready(a), out)

    assert out.decoder_hidden.shape == (1, B, H)
    assert out.decoder_input_concat.shape == (B, 2 * E)
    assert out.decoder_hidden_concat.shape == (B, 2 * E)
    print("KERNEL_OK")
</pallas_src>

<mosaic_0001>
module attributes {stable_mosaic.version = 11 : i64} {
  func.func @_fused_encoder_kernel(%arg0: memref<64x32xf32, #tpu.memory_space<vmem>>, %arg1: memref<8x1xi32, #tpu.memory_space<vmem>>, %arg2: memref<32x384xf32, #tpu.memory_space<vmem>>, %arg3: memref<1x384xf32, #tpu.memory_space<vmem>>, %arg4: memref<128x384xf32, #tpu.memory_space<vmem>>, %arg5: memref<1x384xf32, #tpu.memory_space<vmem>>, %arg6: memref<8x6xf32, #tpu.memory_space<vmem>>, %arg7: memref<6x16xf32, #tpu.memory_space<vmem>>, %arg8: memref<1x16xf32, #tpu.memory_space<vmem>>, %arg9: memref<8x6xf32, #tpu.memory_space<vmem>>, %arg10: memref<6x16xf32, #tpu.memory_space<vmem>>, %arg11: memref<1x16xf32, #tpu.memory_space<vmem>>, %arg12: memref<8x128xf32, #tpu.memory_space<vmem>>, %arg13: memref<8x32xf32, #tpu.memory_space<vmem>>, %arg14: memref<64x384xf32, #tpu.memory_space<vmem>>) attributes {dimension_semantics = [], scalar_prefetch = 0 : i64, scratch_operands = 1 : i64, tpu.core_type = #tpu.core_type<tc>} {
    %c0 = arith.constant 0 : index
    %c0_0 = arith.constant 0 : index
    %0 = vector.load %arg0[%c0, %c0_0] : memref<64x32xf32, #tpu.memory_space<vmem>>, vector<64x32xf32>
    %c0_1 = arith.constant 0 : index
    %c0_2 = arith.constant 0 : index
    %1 = vector.load %arg2[%c0_1, %c0_2] : memref<32x384xf32, #tpu.memory_space<vmem>>, vector<32x384xf32>
    %cst = arith.constant dense<0.000000e+00> : vector<64x384xf32>
    %2 = tpu.matmul %0, %1, %cst {dimension_numbers = #tpu.dot_dimension_numbers<[1], [0], [0], [1], [0, 0, 1, 1], [], []>} : vector<64x32xf32>, vector<32x384xf32>, vector<64x384xf32> -> vector<64x384xf32>
    %c0_3 = arith.constant 0 : index
    %c0_4 = arith.constant 0 : index
    %3 = vector.load %arg3[%c0_3, %c0_4] : memref<1x384xf32, #tpu.memory_space<vmem>>, vector<1x384xf32>
    %4 = vector.broadcast %3 : vector<1x384xf32> to vector<64x384xf32>
    %5 = arith.addf %2, %4 : vector<64x384xf32>
    %c0_5 = arith.constant 0 : index
    %c0_6 = arith.constant 0 : index
    %6 = vector.load %arg14[%c0_5, %c0_6] : memref<64x384xf32, #tpu.memory_space<vmem>>, vector<64x384xf32>
    tpu.vector_store %arg14[%c0_5, %c0_6], %5 {strides = array<i32>} : memref<64x384xf32, #tpu.memory_space<vmem>>, vector<64x384xf32>,
    %c0_7 = arith.constant 0 : index
    %c0_8 = arith.constant 0 : index
    %7 = vector.load %arg1[%c0_7, %c0_8] : memref<8x1xi32, #tpu.memory_space<vmem>>, vector<8x1xi32>
    %cst_9 = arith.constant 0.000000e+00 : f32
    %8 = vector.broadcast %cst_9 : f32 to vector<8x128xf32>
    %c0_i32 = arith.constant 0 : i32
    %c8_i32 = arith.constant 8 : i32
    %9 = arith.muli %c0_i32, %c8_i32 : i32
    %10 = tpu.assume_multiple %9, 8 : i32
    %11 = arith.index_cast %10 : i32 to index
    %c0_10 = arith.constant 0 : index
    %12 = vector.load %arg14[%11, %c0_10] : memref<64x384xf32, #tpu.memory_space<vmem>>, vector<8x384xf32>
    %c0_11 = arith.constant 0 : index
    %c0_12 = arith.constant 0 : index
    %13 = vector.load %arg4[%c0_11, %c0_12] : memref<128x384xf32, #tpu.memory_space<vmem>>, vector<128x384xf32>
    %cst_13 = arith.constant dense<0.000000e+00> : vector<8x384xf32>
    %14 = tpu.matmul %8, %13, %cst_13 {dimension_numbers = #tpu.dot_dimension_numbers<[1], [0], [0], [1], [0, 0, 1, 1], [], []>} : vector<8x128xf32>, vector<128x384xf32>, vector<8x384xf32> -> vector<8x384xf32>
    %c0_14 = arith.constant 0 : index
    %c0_15 = arith.constant 0 : index
    %15 = vector.load %arg5[%c0_14, %c0_15] : memref<1x384xf32, #tpu.memory_space<vmem>>, vector<1x384xf32>
    %16 = vector.broadcast %15 : vector<1x384xf32> to vector<8x384xf32>
    %17 = arith.addf %14, %16 : vector<8x384xf32>
    %18 = vector.extract_strided_slice %12 {offsets = [0, 0], sizes = [8, 128], strides = [1, 1]} : vector<8x384xf32> to vector<8x128xf32>
    %19 = vector.extract_strided_slice %17 {offsets = [0, 0], sizes = [8, 128], strides = [1, 1]} : vector<8x384xf32> to vector<8x128xf32>
    %20 = arith.addf %18, %19 : vector<8x128xf32>
    %21 = arith.negf %20 : vector<8x128xf32>
    %22 = math.exp %21 : vector<8x128xf32>
    %cst_16 = arith.constant 1.000000e+00 : f32
    %23 = vector.broadcast %cst_16 : f32 to vector<8x128xf32>
    %24 = arith.addf %23, %22 : vector<8x128xf32>
    %25 = arith.divf %23, %24 : vector<8x128xf32>
    %26 = vector.extract_strided_slice %12 {offsets = [0, 128], sizes = [8, 128], strides = [1, 1]} : vector<8x384xf32> to vector<8x128xf32>
    %27 = vector.extract_strided_slice %17 {offsets = [0, 128], sizes = [8, 128], strides = [1, 1]} : vector<8x384xf32> to vector<8x128xf32>
    %28 = arith.addf %26, %27 : vector<8x128xf32>
    %29 = arith.negf %28 : vector<8x128xf32>
    %30 = math.exp %29 : vector<8x128xf32>
    %cst_17 = arith.constant 1.000000e+00 : f32
    %31 = vector.broadcast %cst_17 : f32 to vector<8x128xf32>
    %32 = arith.addf %31, %30 : vector<8x128xf32>
    %33 = arith.divf %31, %32 : vector<8x128xf32>
    %34 = vector.extract_strided_slice %12 {offsets = [0, 256], sizes = [8, 128], strides = [1, 1]} : vector<8x384xf32> to vector<8x128xf32>
    %35 = vector.extract_strided_slice %17 {offsets = [0, 256], sizes = [8, 128], strides = [1, 1]} : vector<8x384xf32> to vector<8x128xf32>
    %36 = arith.mulf %25, %35 : vector<8x128xf32>
    %37 = arith.addf %34, %36 : vector<8x128xf32>
    %38 = math.tanh %37 : vector<8x128xf32>
    %cst_18 = arith.constant 1.000000e+00 : f32
    %39 = vector.broadcast %cst_18 : f32 to vector<8x128xf32>
    %40 = arith.subf %39, %33 : vector<8x128xf32>
    %41 = arith.mulf %40, %38 : vector<8x128xf32>
    %42 = arith.mulf %33, %8 : vector<8x128xf32>
    %43 = arith.addf %41, %42 : vector<8x128xf32>
    %44 = vector.broadcast %c0_i32 : i32 to vector<8x1xi32>
    %45 = arith.cmpi slt, %44, %7 : vector<8x1xi32>
    %46 = vector.shape_cast %45 : vector<8x1xi1> to vector<8x1xi1>
    %47 = vector.broadcast %46 : vector<8x1xi1> to vector<8x128xi1>
    %48 = arith.select %47, %43, %8 : vector<8x128xi1>, vector<8x128xf32>
    %c1_i32 = arith.constant 1 : i32
    %c8_i32_19 = arith.constant 8 : i32
    %49 = arith.muli %c1_i32, %c8_i32_19 : i32
    %50 = tpu.assume_multiple %49, 8 : i32
    %51 = arith.index_cast %50 : i32 to index
    %c0_20 = arith.constant 0 : index
    %52 = vector.load %arg14[%51, %c0_20] : memref<64x384xf32, #tpu.memory_space<vmem>>, vector<8x384xf32>
    %c0_21 = arith.constant 0 : index
    %c0_22 = arith.constant 0 : index
    %53 = vector.load %arg4[%c0_21, %c0_22] : memref<128x384xf32, #tpu.memory_space<vmem>>, vector<128x384xf32>
    %cst_23 = arith.constant dense<0.000000e+00> : vector<8x384xf32>
    %54 = tpu.matmul %48, %53, %cst_23 {dimension_numbers = #tpu.dot_dimension_numbers<[1], [0], [0], [1], [0, 0, 1, 1], [], []>} : vector<8x128xf32>, vector<128x384xf32>, vector<8x384xf32> -> vector<8x384xf32>
    %c0_24 = arith.constant 0 : index
    %c0_25 = arith.constant 0 : index
    %55 = vector.load %arg5[%c0_24, %c0_25] : memref<1x384xf32, #tpu.memory_space<vmem>>, vector<1x384xf32>
    %56 = vector.broadcast %55 : vector<1x384xf32> to vector<8x384xf32>
    %57 = arith.addf %54, %56 : vector<8x384xf32>
    %58 = vector.extract_strided_slice %52 {offsets = [0, 0], sizes = [8, 128], strides = [1, 1]} : vector<8x384xf32> to vector<8x128xf32>
    %59 = vector.extract_strided_slice %57 {offsets = [0, 0], sizes = [8, 128], strides = [1, 1]} : vector<8x384xf32> to vector<8x128xf32>
    %60 = arith.addf %58, %59 : vector<8x128xf32>
    %61 = arith.negf %60 : vector<8x128xf32>
    %62 = math.exp %61 : vector<8x128xf32>
    %cst_26 = arith.constant 1.000000e+00 : f32
    %63 = vector.broadcast %cst_26 : f32 to vector<8x128xf32>
    %64 = arith.addf %63, %62 : vector<8x128xf32>
    %65 = arith.divf %63, %64 : vector<8x128xf32>
    %66 = vector.extract_strided_slice %52 {offsets = [0, 128], sizes = [8, 128], strides = [1, 1]} : vector<8x384xf32> to vector<8x128xf32>
    %67 = vector.extract_strided_slice %57 {offsets = [0, 128], sizes = [8, 128], strides = [1, 1]} : vector<8x384xf32> to vector<8x128xf32>
    %68 = arith.addf %66, %67 : vector<8x128xf32>
    %69 = arith.negf %68 : vector<8x128xf32>
    %70 = math.exp %69 : vector<8x128xf32>
    %cst_27 = arith.constant 1.000000e+00 : f32
    %71 = vector.broadcast %cst_27 : f32 to vector<8x128xf32>
    %72 = arith.addf %71, %70 : vector<8x128xf32>
    %73 = arith.divf %71, %72 : vector<8x128xf32>
    %74 = vector.extract_strided_slice %52 {offsets = [0, 256], sizes = [8, 128], strides = [1, 1]} : vector<8x384xf32> to vector<8x128xf32>
    %75 = vector.extract_strided_slice %57 {offsets = [0, 256], sizes = [8, 128], strides = [1, 1]} : vector<8x384xf32> to vector<8x128xf32>
    %76 = arith.mulf %65, %75 : vector<8x128xf32>
    %77 = arith.addf %74, %76 : vector<8x128xf32>
    %78 = math.tanh %77 : vector<8x128xf32>
    %cst_28 = arith.constant 1.000000e+00 : f32
    %79 = vector.broadcast %cst_28 : f32 to vector<8x128xf32>
    %80 = arith.subf %79, %73 : vector<8x128xf32>
    %81 = arith.mulf %80, %78 : vector<8x128xf32>
    %82 = arith.mulf %73, %48 : vector<8x128xf32>
    %83 = arith.addf %81, %82 : vector<8x128xf32>
    %84 = vector.broadcast %c1_i32 : i32 to vector<8x1xi32>
    %85 = arith.cmpi slt, %84, %7 : vector<8x1xi32>
    %86 = vector.shape_cast %85 : vector<8x1xi1> to vector<8x1xi1>
    %87 = vector.broadcast %86 : vector<8x1xi1> to vector<8x128xi1>
    %88 = arith.select %87, %83, %48 : vector<8x128xi1>, vector<8x128xf32>
    %c2_i32 = arith.constant 2 : i32
    %c8_i32_29 = arith.constant 8 : i32
    %89 = arith.muli %c2_i32, %c8_i32_29 : i32
    %90 = tpu.assume_multiple %89, 8 : i32
    %91 = arith.index_cast %90 : i32 to index
    %c0_30 = arith.constant 0 : index
    %92 = vector.load %arg14[%91, %c0_30] : memref<64x384xf32, #tpu.memory_space<vmem>>, vector<8x384xf32>
    %c0_31 = arith.constant 0 : index
    %c0_32 = arith.constant 0 : index
    %93 = vector.load %arg4[%c0_31, %c0_32] : memref<128x384xf32, #tpu.memory_space<vmem>>, vector<128x384xf32>
    %cst_33 = arith.constant dense<0.000000e+00> : vector<8x384xf32>
    %94 = tpu.matmul %88, %93, %cst_33 {dimension_numbers = #tpu.dot_dimension_numbers<[1], [0], [0], [1], [0, 0, 1, 1], [], []>} : vector<8x128xf32>, vector<128x384xf32>, vector<8x384xf32> -> vector<8x384xf32>
    %c0_34 = arith.constant 0 : index
    %c0_35 = arith.constant 0 : index
    %95 = vector.load %arg5[%c0_34, %c0_35] : memref<1x384xf32, #tpu.memory_space<vmem>>, vector<1x384xf32>
    %96 = vector.broadcast %95 : vector<1x384xf32> to vector<8x384xf32>
    %97 = arith.addf %94, %96 : vector<8x384xf32>
    %98 = vector.extract_strided_slice %92 {offsets = [0, 0], sizes = [8, 128], strides = [1, 1]} : vector<8x384xf32> to vector<8x128xf32>
    %99 = vector.extract_strided_slice %97 {offsets = [0, 0], sizes = [8, 128], strides = [1, 1]} : vector<8x384xf32> to vector<8x128xf32>
    %100 = arith.addf %98, %99 : vector<8x128xf32>
    %101 = arith.negf %100 : vector<8x128xf32>
    %102 = math.exp %101 : vector<8x128xf32>
    %cst_36 = arith.constant 1.000000e+00 : f32
    %103 = vector.broadcast %cst_36 : f32 to vector<8x128xf32>
    %104 = arith.addf %103, %102 : vector<8x128xf32>
    %105 = arith.divf %103, %104 : vector<8x128xf32>
    %106 = vector.extract_strided_slice %92 {offsets = [0, 128], sizes = [8, 128], strides = [1, 1]} : vector<8x384xf32> to vector<8x128xf32>
    %107 = vector.extract_strided_slice %97 {offsets = [0, 128], sizes = [8, 128], strides = [1, 1]} : vector<8x384xf32> to vector<8x128xf32>
    %108 = arith.addf %106, %107 : vector<8x128xf32>
    %109 = arith.negf %108 : vector<8x128xf32>
    %110 = math.exp %109 : vector<8x128xf32>
    %cst_37 = arith.constant 1.000000e+00 : f32
    %111 = vector.broadcast %cst_37 : f32 to vector<8x128xf32>
    %112 = arith.addf %111, %110 : vector<8x128xf32>
    %113 = arith.divf %111, %112 : vector<8x128xf32>
    %114 = vector.extract_strided_slice %92 {offsets = [0, 256], sizes = [8, 128], strides = [1, 1]} : vector<8x384xf32> to vector<8x128xf32>
    %115 = vector.extract_strided_slice %97 {offsets = [0, 256], sizes = [8, 128], strides = [1, 1]} : vector<8x384xf32> to vector<8x128xf32>
    %116 = arith.mulf %105, %115 : vector<8x128xf32>
    %117 = arith.addf %114, %116 : vector<8x128xf32>
    %118 = math.tanh %117 : vector<8x128xf32>
    %cst_38 = arith.constant 1.000000e+00 : f32
    %119 = vector.broadcast %cst_38 : f32 to vector<8x128xf32>
    %120 = arith.subf %119, %113 : vector<8x128xf32>
    %121 = arith.mulf %120, %118 : vector<8x128xf32>
    %122 = arith.mulf %113, %88 : vector<8x128xf32>
    %123 = arith.addf %121, %122 : vector<8x128xf32>
    %124 = vector.broadcast %c2_i32 : i32 to vector<8x1xi32>
    %125 = arith.cmpi slt, %124, %7 : vector<8x1xi32>
    %126 = vector.shape_cast %125 : vector<8x1xi1> to vector<8x1xi1>
    %127 = vector.broadcast %126 : vector<8x1xi1> to vector<8x128xi1>
    %128 = arith.select %127, %123, %88 : vector<8x128xi1>, vector<8x128xf32>
    %c3_i32 = arith.constant 3 : i32
    %c8_i32_39 = arith.constant 8 : i32
    %129 = arith.muli %c3_i32, %c8_i32_39 : i32
    %130 = tpu.assume_multiple %129, 8 : i32
    %131 = arith.index_cast %130 : i32 to index
    %c0_40 = arith.constant 0 : index
    %132 = vector.load %arg14[%131, %c0_40] : memref<64x384xf32, #tpu.memory_space<vmem>>, vector<8x384xf32>
    %c0_41 = arith.constant 0 : index
    %c0_42 = arith.constant 0 : index
    %133 = vector.load %arg4[%c0_41, %c0_42] : memref<128x384xf32, #tpu.memory_space<vmem>>, vector<128x384xf32>
    %cst_43 = arith.constant dense<0.000000e+00> : vector<8x384xf32>
    %134 = tpu.matmul %128, %133, %cst_43 {dimension_numbers = #tpu.dot_dimension_numbers<[1], [0], [0], [1], [0, 0, 1, 1], [], []>} : vector<8x128xf32>, vector<128x384xf32>, vector<8x384xf32> -> vector<8x384xf32>
    %c0_44 = arith.constant 0 : index
    %c0_45 = arith.constant 0 : index
    %135 = vector.load %arg5[%c0_44, %c0_45] : memref<1x384xf32, #tpu.memory_space<vmem>>, vector<1x384xf32>
    %136 = vector.broadcast %135 : vector<1x384xf32> to vector<8x384xf32>
    %137 = arith.addf %134, %136 : vector<8x384xf32>
    %138 = vector.extract_strided_slice %132 {offsets = [0, 0], sizes = [8, 128], strides = [1, 1]} : vector<8x384xf32> to vector<8x128xf32>
    %139 = vector.extract_strided_slice %137 {offsets = [0, 0], sizes = [8, 128], strides = [1, 1]} : vector<8x384xf32> to vector<8x128xf32>
    %140 = arith.addf %138, %139 : vector<8x128xf32>
    %141 = arith.negf %140 : vector<8x128xf32>
    %142 = math.exp %141 : vector<8x128xf32>
    %cst_46 = arith.constant 1.000000e+00 : f32
    %143 = vector.broadcast %cst_46 : f32 to vector<8x128xf32>
    %144 = arith.addf %143, %142 : vector<8x128xf32>
    %145 = arith.divf %143, %144 : vector<8x128xf32>
    %146 = vector.extract_strided_slice %132 {offsets = [0, 128], sizes = [8, 128], strides = [1, 1]} : vector<8x384xf32> to vector<8x128xf32>
    %147 = vector.extract_strided_slice %137 {offsets = [0, 128], sizes = [8, 128], strides = [1, 1]} : vector<8x384xf32> to vector<8x128xf32>
    %148 = arith.addf %146, %147 : vector<8x128xf32>
    %149 = arith.negf %148 : vector<8x128xf32>
    %150 = math.exp %149 : vector<8x128xf32>
    %cst_47 = arith.constant 1.000000e+00 : f32
    %151 = vector.broadcast %cst_47 : f32 to vector<8x128xf32>
    %152 = arith.addf %151, %150 : vector<8x128xf32>
    %153 = arith.divf %151, %152 : vector<8x128xf32>
    %154 = vector.extract_strided_slice %132 {offsets = [0, 256], sizes = [8, 128], strides = [1, 1]} : vector<8x384xf32> to vector<8x128xf32>
    %155 = vector.extract_strided_slice %137 {offsets = [0, 256], sizes = [8, 128], strides = [1, 1]} : vector<8x384xf32> to vector<8x128xf32>
    %156 = arith.mulf %145, %155 : vector<8x128xf32>
    %157 = arith.addf %154, %156 : vector<8x128xf32>
    %158 = math.tanh %157 : vector<8x128xf32>
    %cst_48 = arith.constant 1.000000e+00 : f32
    %159 = vector.broadcast %cst_48 : f32 to vector<8x128xf32>
    %160 = arith.subf %159, %153 : vector<8x128xf32>
    %161 = arith.mulf %160, %158 : vector<8x128xf32>
    %162 = arith.mulf %153, %128 : vector<8x128xf32>
    %163 = arith.addf %161, %162 : vector<8x128xf32>
    %164 = vector.broadcast %c3_i32 : i32 to vector<8x1xi32>
    %165 = arith.cmpi slt, %164, %7 : vector<8x1xi32>
    %166 = vector.shape_cast %165 : vector<8x1xi1> to vector<8x1xi1>
    %167 = vector.broadcast %166 : vector<8x1xi1> to vector<8x128xi1>
    %168 = arith.select %167, %163, %128 : vector<8x128xi1>, vector<8x128xf32>
    %c4_i32 = arith.constant 4 : i32
    %c8_i32_49 = arith.constant 8 : i32
    %169 = arith.muli %c4_i32, %c8_i32_49 : i32
    %170 = tpu.assume_multiple %169, 8 : i32
    %171 = arith.index_cast %170 : i32 to index
    %c0_50 = arith.constant 0 : index
    %172 = vector.load %arg14[%171, %c0_50] : memref<64x384xf32, #tpu.memory_space<vmem>>, vector<8x384xf32>
    %c0_51 = arith.constant 0 : index
    %c0_52 = arith.constant 0 : index
    %173 = vector.load %arg4[%c0_51, %c0_52] : memref<128x384xf32, #tpu.memory_space<vmem>>, vector<128x384xf32>
    %cst_53 = arith.constant dense<0.000000e+00> : vector<8x384xf32>
    %174 = tpu.matmul %168, %173, %cst_53 {dimension_numbers = #tpu.dot_dimension_numbers<[1], [0], [0], [1], [0, 0, 1, 1], [], []>} : vector<8x128xf32>, vector<128x384xf32>, vector<8x384xf32> -> vector<8x384xf32>
    %c0_54 = arith.constant 0 : index
    %c0_55 = arith.constant 0 : index
    %175 = vector.load %arg5[%c0_54, %c0_55] : memref<1x384xf32, #tpu.memory_space<vmem>>, vector<1x384xf32>
    %176 = vector.broadcast %175 : vector<1x384xf32> to vector<8x384xf32>
    %177 = arith.addf %174, %176 : vector<8x384xf32>
    %178 = vector.extract_strided_slice %172 {offsets = [0, 0], sizes = [8, 128], strides = [1, 1]} : vector<8x384xf32> to vector<8x128xf32>
    %179 = vector.extract_strided_slice %177 {offsets = [0, 0], sizes = [8, 128], strides = [1, 1]} : vector<8x384xf32> to vector<8x128xf32>
    %180 = arith.addf %178, %179 : vector<8x128xf32>
    %181 = arith.negf %180 : vector<8x128xf32>
    %182 = math.exp %181 : vector<8x128xf32>
    %cst_56 = arith.constant 1.000000e+00 : f32
    %183 = vector.broadcast %cst_56 : f32 to vector<8x128xf32>
    %184 = arith.addf %183, %182 : vector<8x128xf32>
    %185 = arith.divf %183, %184 : vector<8x128xf32>
    %186 = vector.extract_strided_slice %172 {offsets = [0, 128], sizes = [8, 128], strides = [1, 1]} : vector<8x384xf32> to vector<8x128xf32>
    %187 = vector.extract_strided_slice %177 {offsets = [0, 128], sizes = [8, 128], strides = [1, 1]} : vector<8x384xf32> to vector<8x128xf32>
    %188 = arith.addf %186, %187 : vector<8x128xf32>
    %189 = arith.negf %188 : vector<8x128xf32>
    %190 = math.exp %189 : vector<8x128xf32>
    %cst_57 = arith.constant 1.000000e+00 : f32
    %191 = vector.broadcast %cst_57 : f32 to vector<8x128xf32>
    %192 = arith.addf %191, %190 : vector<8x128xf32>
    %193 = arith.divf %191, %192 : vector<8x128xf32>
    %194 = vector.extract_strided_slice %172 {offsets = [0, 256], sizes = [8, 128], strides = [1, 1]} : vector<8x384xf32> to vector<8x128xf32>
    %195 = vector.extract_strided_slice %177 {offsets = [0, 256], sizes = [8, 128], strides = [1, 1]} : vector<8x384xf32> to vector<8x128xf32>
    %196 = arith.mulf %185, %195 : vector<8x128xf32>
    %197 = arith.addf %194, %196 : vector<8x128xf32>
    %198 = math.tanh %197 : vector<8x128xf32>
    %cst_58 = arith.constant 1.000000e+00 : f32
    %199 = vector.broadcast %cst_58 : f32 to vector<8x128xf32>
    %200 = arith.subf %199, %193 : vector<8x128xf32>
    %201 = arith.mulf %200, %198 : vector<8x128xf32>
    %202 = arith.mulf %193, %168 : vector<8x128xf32>
    %203 = arith.addf %201, %202 : vector<8x128xf32>
    %204 = vector.broadcast %c4_i32 : i32 to vector<8x1xi32>
    %205 = arith.cmpi slt, %204, %7 : vector<8x1xi32>
    %206 = vector.shape_cast %205 : vector<8x1xi1> to vector<8x1xi1>
    %207 = vector.broadcast %206 : vector<8x1xi1> to vector<8x128xi1>
    %208 = arith.select %207, %203, %168 : vector<8x128xi1>, vector<8x128xf32>
    %c5_i32 = arith.constant 5 : i32
    %c8_i32_59 = arith.constant 8 : i32
    %209 = arith.muli %c5_i32, %c8_i32_59 : i32
    %210 = tpu.assume_multiple %209, 8 : i32
    %211 = arith.index_cast %210 : i32 to index
    %c0_60 = arith.constant 0 : index
    %212 = vector.load %arg14[%211, %c0_60] : memref<64x384xf32, #tpu.memory_space<vmem>>, vector<8x384xf32>
    %c0_61 = arith.constant 0 : index
    %c0_62 = arith.constant 0 : index
    %213 = vector.load %arg4[%c0_61, %c0_62] : memref<128x384xf32, #tpu.memory_space<vmem>>, vector<128x384xf32>
    %cst_63 = arith.constant dense<0.000000e+00> : vector<8x384xf32>
    %214 = tpu.matmul %208, %213, %cst_63 {dimension_numbers = #tpu.dot_dimension_numbers<[1], [0], [0], [1], [0, 0, 1, 1], [], []>} : vector<8x128xf32>, vector<128x384xf32>, vector<8x384xf32> -> vector<8x384xf32>
    %c0_64 = arith.constant 0 : index
    %c0_65 = arith.constant 0 : index
    %215 = vector.load %arg5[%c0_64, %c0_65] : memref<1x384xf32, #tpu.memory_space<vmem>>, vector<1x384xf32>
    %216 = vector.broadcast %215 : vector<1x384xf32> to vector<8x384xf32>
    %217 = arith.addf %214, %216 : vector<8x384xf32>
    %218 = vector.extract_strided_slice %212 {offsets = [0, 0], sizes = [8, 128], strides = [1, 1]} : vector<8x384xf32> to vector<8x128xf32>
    %219 = vector.extract_strided_slice %217 {offsets = [0, 0], sizes = [8, 128], strides = [1, 1]} : vector<8x384xf32> to vector<8x128xf32>
    %220 = arith.addf %218, %219 : vector<8x128xf32>
    %221 = arith.negf %220 : vector<8x128xf32>
    %222 = math.exp %221 : vector<8x128xf32>
    %cst_66 = arith.constant 1.000000e+00 : f32
    %223 = vector.broadcast %cst_66 : f32 to vector<8x128xf32>
    %224 = arith.addf %223, %222 : vector<8x128xf32>
    %225 = arith.divf %223, %224 : vector<8x128xf32>
    %226 = vector.extract_strided_slice %212 {offsets = [0, 128], sizes = [8, 128], strides = [1, 1]} : vector<8x384xf32> to vector<8x128xf32>
    %227 = vector.extract_strided_slice %217 {offsets = [0, 128], sizes = [8, 128], strides = [1, 1]} : vector<8x384xf32> to vector<8x128xf32>
    %228 = arith.addf %226, %227 : vector<8x128xf32>
    %229 = arith.negf %228 : vector<8x128xf32>
    %230 = math.exp %229 : vector<8x128xf32>
    %cst_67 = arith.constant 1.000000e+00 : f32
    %231 = vector.broadcast %cst_67 : f32 to vector<8x128xf32>
    %232 = arith.addf %231, %230 : vector<8x128xf32>
    %233 = arith.divf %231, %232 : vector<8x128xf32>
    %234 = vector.extract_strided_slice %212 {offsets = [0, 256], sizes = [8, 128], strides = [1, 1]} : vector<8x384xf32> to vector<8x128xf32>
    %235 = vector.extract_strided_slice %217 {offsets = [0, 256], sizes = [8, 128], strides = [1, 1]} : vector<8x384xf32> to vector<8x128xf32>
    %236 = arith.mulf %225, %235 : vector<8x128xf32>
    %237 = arith.addf %234, %236 : vector<8x128xf32>
    %238 = math.tanh %237 : vector<8x128xf32>
    %cst_68 = arith.constant 1.000000e+00 : f32
    %239 = vector.broadcast %cst_68 : f32 to vector<8x128xf32>
    %240 = arith.subf %239, %233 : vector<8x128xf32>
    %241 = arith.mulf %240, %238 : vector<8x128xf32>
    %242 = arith.mulf %233, %208 : vector<8x128xf32>
    %243 = arith.addf %241, %242 : vector<8x128xf32>
    %244 = vector.broadcast %c5_i32 : i32 to vector<8x1xi32>
    %245 = arith.cmpi slt, %244, %7 : vector<8x1xi32>
    %246 = vector.shape_cast %245 : vector<8x1xi1> to vector<8x1xi1>
    %247 = vector.broadcast %246 : vector<8x1xi1> to vector<8x128xi1>
    %248 = arith.select %247, %243, %208 : vector<8x128xi1>, vector<8x128xf32>
    %c6_i32 = arith.constant 6 : i32
    %c8_i32_69 = arith.constant 8 : i32
    %249 = arith.muli %c6_i32, %c8_i32_69 : i32
    %250 = tpu.assume_multiple %249, 8 : i32
    %251 = arith.index_cast %250 : i32 to index
    %c0_70 = arith.constant 0 : index
    %252 = vector.load %arg14[%251, %c0_70] : memref<64x384xf32, #tpu.memory_space<vmem>>, vector<8x384xf32>
    %c0_71 = arith.constant 0 : index
    %c0_72 = arith.constant 0 : index
    %253 = vector.load %arg4[%c0_71, %c0_72] : memref<128x384xf32, #tpu.memory_space<vmem>>, vector<128x384xf32>
    %cst_73 = arith.constant dense<0.000000e+00> : vector<8x384xf32>
    %254 = tpu.matmul %248, %253, %cst_73 {dimension_numbers = #tpu.dot_dimension_numbers<[1], [0], [0], [1], [0, 0, 1, 1], [], []>} : vector<8x128xf32>, vector<128x384xf32>, vector<8x384xf32> -> vector<8x384xf32>
    %c0_74 = arith.constant 0 : index
    %c0_75 = arith.constant 0 : index
    %255 = vector.load %arg5[%c0_74, %c0_75] : memref<1x384xf32, #tpu.memory_space<vmem>>, vector<1x384xf32>
    %256 = vector.broadcast %255 : vector<1x384xf32> to vector<8x384xf32>
    %257 = arith.addf %254, %256 : vector<8x384xf32>
    %258 = vector.extract_strided_slice %252 {offsets = [0, 0], sizes = [8, 128], strides = [1, 1]} : vector<8x384xf32> to vector<8x128xf32>
    %259 = vector.extract_strided_slice %257 {offsets = [0, 0], sizes = [8, 128], strides = [1, 1]} : vector<8x384xf32> to vector<8x128xf32>
    %260 = arith.addf %258, %259 : vector<8x128xf32>
    %261 = arith.negf %260 : vector<8x128xf32>
    %262 = math.exp %261 : vector<8x128xf32>
    %cst_76 = arith.constant 1.000000e+00 : f32
    %263 = vector.broadcast %cst_76 : f32 to vector<8x128xf32>
    %264 = arith.addf %263, %262 : vector<8x128xf32>
    %265 = arith.divf %263, %264 : vector<8x128xf32>
    %266 = vector.extract_strided_slice %252 {offsets = [0, 128], sizes = [8, 128], strides = [1, 1]} : vector<8x384xf32> to vector<8x128xf32>
    %267 = vector.extract_strided_slice %257 {offsets = [0, 128], sizes = [8, 128], strides = [1, 1]} : vector<8x384xf32> to vector<8x128xf32>
    %268 = arith.addf %266, %267 : vector<8x128xf32>
    %269 = arith.negf %268 : vector<8x128xf32>
    %270 = math.exp %269 : vector<8x128xf32>
    %cst_77 = arith.constant 1.000000e+00 : f32
    %271 = vector.broadcast %cst_77 : f32 to vector<8x128xf32>
    %272 = arith.addf %271, %270 : vector<8x128xf32>
    %273 = arith.divf %271, %272 : vector<8x128xf32>
    %274 = vector.extract_strided_slice %252 {offsets = [0, 256], sizes = [8, 128], strides = [1, 1]} : vector<8x384xf32> to vector<8x128xf32>
    %275 = vector.extract_strided_slice %257 {offsets = [0, 256], sizes = [8, 128], strides = [1, 1]} : vector<8x384xf32> to vector<8x128xf32>
    %276 = arith.mulf %265, %275 : vector<8x128xf32>
    %277 = arith.addf %274, %276 : vector<8x128xf32>
    %278 = math.tanh %277 : vector<8x128xf32>
    %cst_78 = arith.constant 1.000000e+00 : f32
    %279 = vector.broadcast %cst_78 : f32 to vector<8x128xf32>
    %280 = arith.subf %279, %273 : vector<8x128xf32>
    %281 = arith.mulf %280, %278 : vector<8x128xf32>
    %282 = arith.mulf %273, %248 : vector<8x128xf32>
    %283 = arith.addf %281, %282 : vector<8x128xf32>
    %284 = vector.broadcast %c6_i32 : i32 to vector<8x1xi32>
    %285 = arith.cmpi slt, %284, %7 : vector<8x1xi32>
    %286 = vector.shape_cast %285 : vector<8x1xi1> to vector<8x1xi1>
    %287 = vector.broadcast %286 : vector<8x1xi1> to vector<8x128xi1>
    %288 = arith.select %287, %283, %248 : vector<8x128xi1>, vector<8x128xf32>
    %c7_i32 = arith.constant 7 : i32
    %c8_i32_79 = arith.constant 8 : i32
    %289 = arith.muli %c7_i32, %c8_i32_79 : i32
    %290 = tpu.assume_multiple %289, 8 : i32
    %291 = arith.index_cast %290 : i32 to index
    %c0_80 = arith.constant 0 : index
    %292 = vector.load %arg14[%291, %c0_80] : memref<64x384xf32, #tpu.memory_space<vmem>>, vector<8x384xf32>
    %c0_81 = arith.constant 0 : index
    %c0_82 = arith.constant 0 : index
    %293 = vector.load %arg4[%c0_81, %c0_82] : memref<128x384xf32, #tpu.memory_space<vmem>>, vector<128x384xf32>
    %cst_83 = arith.constant dense<0.000000e+00> : vector<8x384xf32>
    %294 = tpu.matmul %288, %293, %cst_83 {dimension_numbers = #tpu.dot_dimension_numbers<[1], [0], [0], [1], [0, 0, 1, 1], [], []>} : vector<8x128xf32>, vector<128x384xf32>, vector<8x384xf32> -> vector<8x384xf32>
    %c0_84 = arith.constant 0 : index
    %c0_85 = arith.constant 0 : index
    %295 = vector.load %arg5[%c0_84, %c0_85] : memref<1x384xf32, #tpu.memory_space<vmem>>, vector<1x384xf32>
    %296 = vector.broadcast %295 : vector<1x384xf32> to vector<8x384xf32>
    %297 = arith.addf %294, %296 : vector<8x384xf32>
    %298 = vector.extract_strided_slice %292 {offsets = [0, 0], sizes = [8, 128], strides = [1, 1]} : vector<8x384xf32> to vector<8x128xf32>
    %299 = vector.extract_strided_slice %297 {offsets = [0, 0], sizes = [8, 128], strides = [1, 1]} : vector<8x384xf32> to vector<8x128xf32>
    %300 = arith.addf %298, %299 : vector<8x128xf32>
    %301 = arith.negf %300 : vector<8x128xf32>
    %302 = math.exp %301 : vector<8x128xf32>
    %cst_86 = arith.constant 1.000000e+00 : f32
    %303 = vector.broadcast %cst_86 : f32 to vector<8x128xf32>
    %304 = arith.addf %303, %302 : vector<8x128xf32>
    %305 = arith.divf %303, %304 : vector<8x128xf32>
    %306 = vector.extract_strided_slice %292 {offsets = [0, 128], sizes = [8, 128], strides = [1, 1]} : vector<8x384xf32> to vector<8x128xf32>
    %307 = vector.extract_strided_slice %297 {offsets = [0, 128], sizes = [8, 128], strides = [1, 1]} : vector<8x384xf32> to vector<8x128xf32>
    %308 = arith.addf %306, %307 : vector<8x128xf32>
    %309 = arith.negf %308 : vector<8x128xf32>
    %310 = math.exp %309 : vector<8x128xf32>
    %cst_87 = arith.constant 1.000000e+00 : f32
    %311 = vector.broadcast %cst_87 : f32 to vector<8x128xf32>
    %312 = arith.addf %311, %310 : vector<8x128xf32>
    %313 = arith.divf %311, %312 : vector<8x128xf32>
    %314 = vector.extract_strided_slice %292 {offsets = [0, 256], sizes = [8, 128], strides = [1, 1]} : vector<8x384xf32> to vector<8x128xf32>
    %315 = vector.extract_strided_slice %297 {offsets = [0, 256], sizes = [8, 128], strides = [1, 1]} : vector<8x384xf32> to vector<8x128xf32>
    %316 = arith.mulf %305, %315 : vector<8x128xf32>
    %317 = arith.addf %314, %316 : vector<8x128xf32>
    %318 = math.tanh %317 : vector<8x128xf32>
    %cst_88 = arith.constant 1.000000e+00 : f32
    %319 = vector.broadcast %cst_88 : f32 to vector<8x128xf32>
    %320 = arith.subf %319, %313 : vector<8x128xf32>
    %321 = arith.mulf %320, %318 : vector<8x128xf32>
    %322 = arith.mulf %313, %288 : vector<8x128xf32>
    %323 = arith.addf %321, %322 : vector<8x128xf32>
    %324 = vector.broadcast %c7_i32 : i32 to vector<8x1xi32>
    %325 = arith.cmpi slt, %324, %7 : vector<8x1xi32>
    %326 = vector.shape_cast %325 : vector<8x1xi1> to vector<8x1xi1>
    %327 = vector.broadcast %326 : vector<8x1xi1> to vector<8x128xi1>
    %328 = arith.select %327, %323, %288 : vector<8x128xi1>, vector<8x128xf32>
    %c8_i32_89 = arith.constant 8 : i32
    %c0_90 = arith.constant 0 : index
    %c0_91 = arith.constant 0 : index
    %329 = vector.load %arg12[%c0_90, %c0_91] : memref<8x128xf32, #tpu.memory_space<vmem>>, vector<8x128xf32>
    tpu.vector_store %arg12[%c0_90, %c0_91], %328 {strides = array<i32>} : memref<8x128xf32, #tpu.memory_space<vmem>>, vector<8x128xf32>,
    %c0_92 = arith.constant 0 : index
    %c0_93 = arith.constant 0 : index
    %330 = vector.load %arg6[%c0_92, %c0_93] : memref<8x6xf32, #tpu.memory_space<vmem>>, vector<8x6xf32>
    %c0_94 = arith.constant 0 : index
    %c0_95 = arith.constant 0 : index
    %331 = vector.load %arg7[%c0_94, %c0_95] : memref<6x16xf32, #tpu.memory_space<vmem>>, vector<6x16xf32>
    %cst_96 = arith.constant dense<0.000000e+00> : vector<8x16xf32>
    %332 = tpu.matmul %330, %331, %cst_96 {dimension_numbers = #tpu.dot_dimension_numbers<[1], [0], [0], [1], [0, 0, 1, 1], [], []>} : vector<8x6xf32>, vector<6x16xf32>, vector<8x16xf32> -> vector<8x16xf32>
    %c0_97 = arith.constant 0 : index
    %c0_98 = arith.constant 0 : index
    %333 = vector.load %arg8[%c0_97, %c0_98] : memref<1x16xf32, #tpu.memory_space<vmem>>, vector<1x16xf32>
    %334 = vector.broadcast %333 : vector<1x16xf32> to vector<8x16xf32>
    %335 = arith.addf %332, %334 : vector<8x16xf32>
    %c0_99 = arith.constant 0 : index
    %c0_100 = arith.constant 0 : index
    %336 = vector.load %arg9[%c0_99, %c0_100] : memref<8x6xf32, #tpu.memory_space<vmem>>, vector<8x6xf32>
    %c0_101 = arith.constant 0 : index
    %c0_102 = arith.constant 0 : index
    %337 = vector.load %arg10[%c0_101, %c0_102] : memref<6x16xf32, #tpu.memory_space<vmem>>, vector<6x16xf32>
    %cst_103 = arith.constant dense<0.000000e+00> : vector<8x16xf32>
    %338 = tpu.matmul %336, %337, %cst_103 {dimension_numbers = #tpu.dot_dimension_numbers<[1], [0], [0], [1], [0, 0, 1, 1], [], []>} : vector<8x6xf32>, vector<6x16xf32>, vector<8x16xf32> -> vector<8x16xf32>
    %c0_104 = arith.constant 0 : index
    %c0_105 = arith.constant 0 : index
    %339 = vector.load %arg11[%c0_104, %c0_105] : memref<1x16xf32, #tpu.memory_space<vmem>>, vector<1x16xf32>
    %340 = vector.broadcast %339 : vector<1x16xf32> to vector<8x16xf32>
    %341 = arith.addf %338, %340 : vector<8x16xf32>
    %cst_106 = arith.constant 0.000000e+00 : f32
    %342 = vector.broadcast %cst_106 : f32 to vector<8x16xf32>
    %343 = arith.maximumf %335, %342 : vector<8x16xf32>
    %c0_107 = arith.constant 0 : index
    %c0_108 = arith.constant 0 : index
    %344 = vector.load %arg13[%c0_107, %c0_108] : memref<8x32xf32, #tpu.memory_space<vmem>>, vector<8x16xf32>
    tpu.vector_store %arg13[%c0_107, %c0_108], %343 {strides = array<i32>} : memref<8x32xf32, #tpu.memory_space<vmem>>, vector<8x16xf32>,
    %cst_109 = arith.constant 0.000000e+00 : f32
    %345 = vector.broadcast %cst_109 : f32 to vector<8x16xf32>
    %346 = arith.maximumf %341, %345 : vector<8x16xf32>
    %c0_110 = arith.constant 0 : index
    %c16 = arith.constant 16 : index
    %347 = vector.load %arg13[%c0_110, %c16] : memref<8x32xf32, #tpu.memory_space<vmem>>, vector<8x16xf32>
    tpu.vector_store %arg13[%c0_110, %c16], %346 {strides = array<i32>} : memref<8x32xf32, #tpu.memory_space<vmem>>, vector<8x16xf32>,
    return
  }
}

</mosaic_0001>

<bundles_post_ra>
// kernel: tpu_custom_call.1
= control target key start
LH: loop header
LB: loop body
LE: loop exit
PB: predicated region body
PF: predicated region fallthrough
CT: control target
= control target key end

     0   :  { %19 = vsyncpa [#allocation4], 0  ;;  %s3969_s0 = inlined_call_operand.vmem [shape: f32[64,32], index: 0, kind: input, shape index: {}]   ;;  %s3970_s1 = inlined_call_operand.vmem [shape: s32[8,1], index: 1, kind: input, shape index: {}]   ;;  %s3971_s2 = inlined_call_operand.vmem [shape: f32[32,384], index: 2, kind: input, shape index: {}]   ;;  %s3972_s3 = inlined_call_operand.hbm [shape: f32[1,384], index: 3, kind: input, shape index: {}]   ;;  %s3973_s4 = inlined_call_operand.hbm [shape: f32[128,384], index: 4, kind: input, shape index: {}]   ;;  %s3974_s5 = inlined_call_operand.hbm [shape: f32[1,384], index: 5, kind: input, shape index: {}]   ;;  %s3975_s6 = inlined_call_operand.vmem [shape: f32[8,6], index: 6, kind: input, shape index: {}]   ;;  %s3976_s7 = inlined_call_operand.vmem [shape: f32[6,16], index: 7, kind: input, shape index: {}]   ;;  %s3977_s8 = inlined_call_operand.vmem [shape: f32[1,16], index: 8, kind: input, shape index: {}]   ;;  %s3978_s9 = inlined_call_operand.vmem [shape: f32[8,6], index: 9, kind: input, shape index: {}]   ;;  %s3979_s10 = inlined_call_operand.hbm [shape: f32[6,16], index: 10, kind: input, shape index: {}]   ;;  %s3980_s11 = inlined_call_operand.vmem [shape: f32[1,16], index: 11, kind: input, shape index: {}]   ;;  %s3981_s12 = inlined_call_operand.hbm [shape: f32[8,128], index: 12, kind: output, shape index: {0}]   ;;  %s3982_s13 = inlined_call_operand.hbm [shape: f32[8,32], index: 13, kind: output, shape index: {1}]  }
   0x1   :  { %20 = vsyncpa [#allocation7], 0 }
   0x2   :  { %21 = vsyncpa [#allocation10], 0 }
   0x3   :  { %22 = vsyncpa [#allocation5], 0 }
   0x4   :  { %23 = vsyncpa [#allocation13], 0  ;;  %s2859_s25 = smov [#allocation6]  }
   0x5   :  { %s45_s26 = sshll.u32 %s2859_s25, 4  ;;  %s46_s26 = int_to_ptr.vmem [resolvable:$true] %s45_s26 }
   0x6   :  { %s2737_s27 = scalar_lea.vmem %s46_s26, 6144  ;;  %p2742_p1 = scmp.lt.s32.totalorder %s46_s26, %s46_s26 }
   0x7   :  { %p2738_p0 = scmp.ne.s32.totalorder %s46_s26, %s2737_s27  ;;  %p2743_p2 = scmp.lt.s32.totalorder %s2737_s27, %s2737_s27 }
   0x9   :  { %p2744_p3 = por %p2743_p2, %p2742_p1 }
   0xb   :  { %p2745_p4 = pnand %p2744_p3, %p2738_p0 }
   0xd   :  { %2748 = shalt.err (!%p2745_p4)
}
   0xe   :  { %s2860_s28 = smov 384   ;;  %s2861_s29 = smov 24  }
   0xf   :  { %51 = dma.hbm_to_vmem [thread:$0]  %s3973_s4, 6144, %s46_s26, [#allocation7], %s2860_s28, %s2860_s28, %s2861_s29  }
  0x10   :  { %s2862_s15 = smov [#allocation3]   ;;  %s2863_s17 = smov [#allocation8]  }
  0x11   :  { %s36_s16 = sshll.u32 %s2862_s15, 4  ;;  %s58_s18 = sshll.u32 %s2863_s17, 4  ;;  %s37_s16 = int_to_ptr.vmem [resolvable:$true] %s36_s16  ;;  %s59_s18 = int_to_ptr.vmem [resolvable:$true] %s58_s18 }
  0x12   :  { %s2757_s19 = scalar_lea.vmem %s37_s16, 48  ;;  %s2761_s20 = scalar_lea.vmem %s37_s16, 64 }
  0x13   :  { %p2758_p5 = scmp.ne.s32.totalorder %s37_s16, %s2757_s19  ;;  %p2762_p6 = scmp.lt.s32.totalorder %s37_s16, %s37_s16 }
  0x14   :  { %p2763_p7 = scmp.lt.s32.totalorder %s2761_s20, %s2757_s19 }
  0x16   :  { %p2764_p8 = por %p2763_p7, %p2762_p6 }
  0x18   :  { %p2765_p9 = pnand %p2764_p8, %p2758_p5 }
  0x1a   :  { %2768 = shalt.err (!%p2765_p9)
}
  0x1b   :  { %39 = dma.hbm_to_vmem [thread:$0]  %s3972_s3, 48, %s37_s16, [#allocation4]  }
  0x1c   :  { %s2777_s23 = scalar_lea.vmem %s59_s18, 48  ;;  %s2781_s4 = scalar_lea.vmem %s59_s18, 64 }
  0x1d   :  { %p2778_p10 = scmp.ne.s32.totalorder %s59_s18, %s2777_s23  ;;  %p2782_p11 = scmp.lt.s32.totalorder %s59_s18, %s59_s18 }
  0x1e   :  { %p2783_p12 = scmp.lt.s32.totalorder %s2781_s4, %s2777_s23 }
  0x20   :  { %p2784_p13 = por %p2783_p12, %p2782_p11 }
  0x22   :  { %p2785_p0 = pnand %p2784_p13, %p2778_p10 }
  0x24   :  { %2788 = shalt.err (!%p2785_p0)
}
  0x25   :  { %61 = dma.hbm_to_vmem [thread:$0]  %s3974_s5, 48, %s59_s18, [#allocation7]  }
  0x26   :  { %s2864_s26 = smov [#allocation9]  }
  0x27   :  { %s76_s27 = sshll.u32 %s2864_s26, 4  ;;  %s77_s27 = int_to_ptr.vmem [resolvable:$true] %s76_s27 }
  0x28   :  { %s2797_s28 = scalar_lea.vmem %s77_s27, 128  ;;  %p2802_p2 = scmp.lt.s32.totalorder %s77_s27, %s77_s27 }
  0x29   :  { %p2798_p1 = scmp.ne.s32.totalorder %s77_s27, %s2797_s28  ;;  %p2803_p3 = scmp.lt.s32.totalorder %s2797_s28, %s2797_s28 }
  0x2b   :  { %p2804_p4 = por %p2803_p3, %p2802_p2 }
  0x2d   :  { %p2805_p5 = pnand %p2804_p4, %p2798_p1 }
  0x2f   :  { %2808 = shalt.err (!%p2805_p5)
}
  0x30   :  { %79 = dma.hbm_to_vmem [thread:$0]  %s3979_s10, 128, %s77_s27, [#allocation10]  }
  0x31   :  { %2849 = dma.done.wait [#allocation4], 48  }
  0x32   :  { %2850 = vsyncadd [#allocation4], 4294967248 }
  0x33   :  { %2851 = dma.done.wait [#allocation7], 6192  }
  0x34   :  { %2852 = vsyncadd [#allocation7], 4294961104 }
  0x35   :  { %2853 = dma.done.wait [#allocation10], 128  }
  0x36   :  { %2854 = vsyncadd [#allocation10], 4294967168  ;;  %v3985_v0 = vmov 0.0   ;;  %v3983_v1 = vmov 0   ;;  %v112_v2 = vld [vmem:[%s3971_s2 + $0x50] sm:$0xff]  ;;  %v111_v3 = vld [vmem:[%s3971_s2 + $0x48] sm:$0xff] }
  0x37   :  { %220 = vmatprep.mubr.f32.mxu0 %v3985_v0  ;;  %2599 = vset.pattern.permute.xlu0 %v3983_v1  ;;  %v109_v4 = vld [vmem:[%s3971_s2 + $0x38] sm:$0xff]  ;;  %v108_v5 = vld [vmem:[%s3971_s2 + $0x30] sm:$0xff]  ;;  %v106_v6 = vld [vmem:[%s3971_s2 + $0x20] sm:$0xff]  ;;  %vm131_vm0 = vcmask 261120   ;;  %vm2867_vm5 = vmmov 0  }
  0x38   :  { %2600 = vset.pattern.permute.xlu1 %v3983_v1  ;;  %180 = vmatprep.subr.mxu0 %v112_v2  ;;  %v94_v7 = vld [vmem:[%s3969_s0] sm:$0xff]  ;;  %v105_v8 = vld [vmem:[%s3971_s2 + $0x18] sm:$0xff]  ;;  %v103_v9 = vld [vmem:[%s3971_s2 + $0x8] sm:$0xff] }
  0x39   :  { %181 = vmatpush1.msra.mxu0 %v111_v3  ;;  %2285 = vmatprep.mubr.msk.f32.mxu1 %vm131_vm0, %v94_v7  ;;  %v102_v10 = vld [vmem:[%s3971_s2] sm:$0xff]  ;;  %v2984_v11 = vld [vmem:[#allocation6 + $0x170] sm:$0xff]  ;;  %v2986_v12 = vld [vmem:[#allocation6 + $0x168] sm:$0xff] }
  0x3a   :  { %182 = vmatprep.subr.mxu0 %v109_v4  ;;  %4018 = vst [vmem:[#allocation19_spill] sm:$0xff] %v2984_v11  ;;  %v2988_v13 = vld [vmem:[#allocation6 + $0x158] sm:$0xff]  ;;  %v2992_v14 = vld [vmem:[#allocation6 + $0x150] sm:$0xff]  ;;  %v2999_v15 = vld [vmem:[%s3969_s0 + $0x8] sm:$0xff] }
  0x3b   :  { %183 = vmatpush1.msra.mxu0 %v108_v5  ;;  %v3001_v16 = vld [vmem:[#allocation6 + $0x140] sm:$0xff]  ;;  %v3004_v17 = vld [vmem:[#allocation6 + $0x138] sm:$0xff]  ;;  %v3007_v18 = vld [vmem:[#allocation6 + $0x128] sm:$0xff] }
  0x3c   :  { %184 = vmatprep.subr.mxu0 %v106_v6  ;;  %v3012_v19 = vld [vmem:[#allocation6 + $0x120] sm:$0xff]  ;;  %v113_v20 = vld [vmem:[%s3971_s2 + $0x58] sm:$0xff]  ;;  %v3022_v21 = vld [vmem:[%s3969_s0 + $0x10] sm:$0xff] }
  0x3d   :  { %185 = vmatpush1.msra.mxu0 %v105_v8  ;;  %v3024_v22 = vld [vmem:[#allocation6 + $0x110] sm:$0xff]  ;;  %v3027_v23 = vld [vmem:[#allocation6 + $0x108] sm:$0xff]  ;;  %2277 = vmatprep.subr.mxu1 %v113_v20  ;;  %v3030_v24 = vld [vmem:[#allocation6 + $0xf8] sm:$0xff] }
  0x3e   :  { %186 = vmatprep.subr.mxu0 %v103_v9  ;;  %2278 = vmatpush3.msra.mxu1 %v113_v20  ;;  %v110_v25 = vld [vmem:[%s3971_s2 + $0x40] sm:$0xff]  ;;  %v3038_v26 = vld [vmem:[#allocation6 + $0xf0] sm:$0xff]  ;;  %v3053_v30 = vld [vmem:[#allocation6 + $0xc8] sm:$0xff] }
  0x3f   :  { %187 = vmatpush1.msra.mxu0 %v102_v10  ;;  %v3045_v27 = vld [vmem:[%s3969_s0 + $0x18] sm:$0xff]  ;;  %v3047_v28 = vld [vmem:[#allocation6 + $0xe0] sm:$0xff]  ;;  %2279 = vmatprep.subr.mxu1 %v110_v25  ;;  %v3073_v35 = vld [vmem:[#allocation6 + $0xa8] sm:$0xff] }
  0x40   :  { %2085 = vmatmul.mubr.msk.f32.vlgmr.msra.gmra.mxu0 %vm131_vm0, %v94_v7  ;;  %470 = vmatprep.subr.mxu0 %v2984_v11  ;;  %v3050_v29 = vld [vmem:[#allocation6 + $0xd8] sm:$0xff]  ;;  %v107_v31 = vld [vmem:[%s3971_s2 + $0x28] sm:$0xff]  ;;  %v3070_v34 = vld [vmem:[#allocation6 + $0xb0] sm:$0xff] }
  0x41   :  { %471 = vmatpush1.msra.mxu0 %v2986_v12  ;;  %226 = vmatprep.mubr.f32.mxu0 %v3985_v0  ;;  %v3061_v32 = vld [vmem:[#allocation6 + $0xc0] sm:$0xff]  ;;  %v3076_v36 = vld [vmem:[#allocation6 + $0x98] sm:$0xff]  ;;  %v104_v37 = vld [vmem:[%s3971_s2 + $0x10] sm:$0xff] }
  0x42   :  { %472 = vmatprep.subr.mxu0 %v2988_v13  ;;  %2280 = vmatpush3.msra.mxu1 %v110_v25  ;;  %v3068_v33 = vld [vmem:[%s3969_s0 + $0x20] sm:$0xff]  ;;  %v3084_v38 = vld [vmem:[#allocation6 + $0x90] sm:$0xff]  ;;  %v3091_v39 = vld [vmem:[%s3969_s0 + $0x28] sm:$0xff] }
  0x43   :  { %473 = vmatpush1.msra.mxu0 %v2992_v14  ;;  %2281 = vmatprep.subr.mxu1 %v107_v31  ;;  %v3093_v40 = vld [vmem:[#allocation6 + $0x80] sm:$0xff]  ;;  %v3096_v41 = vld [vmem:[#allocation6 + $0x78] sm:$0xff]  ;;  %v3099_v42 = vld [vmem:[#allocation6 + $0x68] sm:$0xff] }
  0x44   :  { %2086 = vmatmul.mubr.msk.f32.gmra.mxu0 %vm131_vm0, %v2999_v15  ;;  %474 = vmatprep.subr.mxu0 %v3001_v16  ;;  %v3104_v43 = vld [vmem:[#allocation6 + $0x60] sm:$0xff]  ;;  %v100_v44 = vld [vmem:[%s3969_s0 + $0x30] sm:$0xff]  ;;  %v3118_v47 = vld [vmem:[#allocation6 + $0x38] sm:$0xff] }
  0x45   :  { %475 = vmatpush1.msra.mxu0 %v3004_v17  ;;  %232 = vmatprep.mubr.f32.mxu0 %v3985_v0  ;;  %v3111_v45 = vld [vmem:[#allocation6 + $0x50] sm:$0xff]  ;;  %v3114_v46 = vld [vmem:[#allocation6 + $0x48] sm:$0xff]  ;;  %v3122_v48 = vld [vmem:[#allocation6 + $0x178] sm:$0xff] }
  0x46   :  { %476 = vmatprep.subr.mxu0 %v3007_v18  ;;  %2282 = vmatpush3.msra.mxu1 %v107_v31  ;;  %v3126_v49 = vld [vmem:[#allocation6 + $0x30] sm:$0xff]  ;;  %v3133_v51 = vld [vmem:[#allocation6 + $0x20] sm:$0xff]  ;;  %v3141_v53 = vld [vmem:[#allocation6 + $0x18] sm:$0xff] }
  0x47   :  { %477 = vmatpush1.msra.mxu0 %v3012_v19  ;;  %2283 = vmatprep.subr.mxu1 %v104_v37  ;;  %v101_v50 = vld [vmem:[%s3969_s0 + $0x38] sm:$0xff]  ;;  %4019 = vst [vmem:[#allocation20_spill] sm:$0xff] %v3133_v51  ;;  %v3138_v52 = vld [vmem:[%s3970_s1] sm:$0xff]  ;;  %4021 = vst [vmem:[#allocation22_spill] sm:$0xff] %v3141_v53 }
  0x48   :  { %2087 = vmatmul.mubr.msk.f32.gmra.mxu0 %vm131_vm0, %v3022_v21  ;;  %478 = vmatprep.subr.mxu0 %v3024_v22  ;;  %4020 = vst [vmem:[#allocation21_spill] sm:$0xff] %v3138_v52  ;;  %v3145_v54 = vld [vmem:[#allocation6 + $0x8] sm:$0xff]  ;;  %v3148_v55 = vld [vmem:[#allocation6 + $0x160] sm:$0xff]  ;;  %vm632_vm1 = vcmp.gt.s32.totalorder %v3138_v52, 0  ;;  %v3163_v58 = vld [vmem:[#allocation6 + $0x130] sm:$0xff]  ;;  %vm807_vm2 = vcmp.gt.s32.totalorder %v3138_v52, 1 }
  0x49   :  { %479 = vmatpush1.msra.mxu0 %v3027_v23  ;;  %238 = vmatprep.mubr.f32.mxu0 %v3985_v0  ;;  %4022 = vst [vmem:[#allocation23_spill] sm:$0xff] %v3145_v54  ;;  %v3152_v56 = vld [vmem:[#allocation6] sm:$0xff]  ;;  %v3157_v57 = vld [vmem:[#allocation6 + $0x148] sm:$0xff]  ;;  %v633_v59 = vsel %vm632_vm1, 1, %v3983_v1  ;;  %v3170_v60 = vld [vmem:[#allocation6 + $0x118] sm:$0xff]  ;;  %v808_v62 = vsel %vm807_vm2, 1, %v3983_v1 }
  0x4a   :  { %480 = vmatprep.subr.mxu0 %v3030_v24  ;;  %2284 = vmatpush3.msra.mxu1 %v104_v37  ;;  %4023 = vst [vmem:[#allocation24_spill] sm:$0xff] %v3152_v56  ;;  %v3176_v61 = vld [vmem:[#allocation6 + $0x100] sm:$0xff]  ;;  %vm1332_vm3 = vcmp.gt.s32.totalorder %v3138_v52, 4  ;;  %v3186_v63 = vld [vmem:[#allocation6 + $0xe8] sm:$0xff]  ;;  %v3191_v2 = vld [vmem:[#allocation6 + $0xd0] sm:$0xff]  ;;  %vm1682_vm4 = vcmp.gt.s32.totalorder %v3138_v52, 6 }
  0x4b   :  { %481 = vmatpush1.msra.mxu0 %v3038_v26  ;;  %2297 = vmatprep.subr.mxu1 %v3985_v0  ;;  %v1333_v3 = vsel %vm1332_vm3, 1, %v3983_v1  ;;  %v3200_v4 = vld [vmem:[#allocation6 + $0xb8] sm:$0xff]  ;;  %v3205_v5 = vld [vmem:[#allocation6 + $0xa0] sm:$0xff]  ;;  %v1683_v6 = vsel %vm1682_vm4, 1, %v3983_v1  ;;  %v3213_v7 = vld [vmem:[#allocation6 + $0x88] sm:$0xff]  ;;  %vm1878_vm1 = vcmask 1045504  }
  0x4c   :  { %2088 = vmatmul.mubr.msk.f32.gmra.mxu0 %vm131_vm0, %v3045_v27  ;;  %482 = vmatprep.subr.mxu0 %v3047_v28  ;;  %v3218_v8 = vld [vmem:[#allocation6 + $0x70] sm:$0xff]  ;;  %v3224_v9 = vld [vmem:[#allocation6 + $0x58] sm:$0xff]  ;;  %v3230_v10 = vld [vmem:[#allocation6 + $0x40] sm:$0xff]  ;;  %vm1874_vm2 = vcmask 48128   ;;  %vm2038_vm3 = vcmask 130048  }
  0x4d   :  { %483 = vmatpush1.msra.mxu0 %v3050_v29  ;;  %244 = vmatprep.mubr.f32.mxu0 %v3985_v0  ;;  %4024 = vst [vmem:[#allocation25_spill] sm:$0xff] %v3230_v10  ;;  %v3242_v20 = vld [vmem:[#allocation6 + $0x10] sm:$0xff]  ;;  %v114_v31 = vld [vmem:[#allocation3] sm:$0x7] }
  0x4e   :  { %484 = vmatprep.subr.mxu0 %v3053_v30  ;;  %2286 = vmatmul.mubr.msk.f32.vlgmr.msra.gmra.mxu1 %vm131_vm0, %v2999_v15  ;;  %v3236_v15 = vld [vmem:[#allocation6 + $0x28] sm:$0xff]  ;;  %4026 = vst [vmem:[#allocation27_spill] sm:$0xff] %v3242_v20 }
  0x4f   :  { %485 = vmatpush1.msra.mxu0 %v3061_v32  ;;  %2298 = vmatpush3.msra.mxu1 %v3122_v48  ;;  %4025 = vst [vmem:[#allocation26_spill] sm:$0xff] %v3236_v15 }
  0x50   :  { %2089 = vmatmul.mubr.msk.f32.gmra.mxu0 %vm131_vm0, %v3068_v33  ;;  %486 = vmatprep.subr.mxu0 %v3070_v34 }
  0x51   :  { %487 = vmatpush1.msra.mxu0 %v3073_v35  ;;  %250 = vmatprep.mubr.f32.mxu0 %v3985_v0 }
  0x52   :  { %488 = vmatprep.subr.mxu0 %v3076_v36  ;;  %2299 = vmatprep.subr.mxu1 %v3985_v0 }
  0x53   :  { %489 = vmatpush1.msra.mxu0 %v3084_v38  ;;  %2300 = vmatpush3.msra.mxu1 %v3148_v55 }
  0x54   :  { %2090 = vmatmul.mubr.msk.f32.gmra.mxu0 %vm131_vm0, %v3091_v39  ;;  %490 = vmatprep.subr.mxu0 %v3093_v40 }
  0x55   :  { %491 = vmatpush1.msra.mxu0 %v3096_v41  ;;  %256 = vmatprep.mubr.f32.mxu0 %v3985_v0 }
  0x56   :  { %492 = vmatprep.subr.mxu0 %v3099_v42  ;;  %2301 = vmatprep.subr.mxu1 %v3985_v0 }
  0x57   :  { %493 = vmatpush1.msra.mxu0 %v3104_v43  ;;  %2302 = vmatpush3.msra.mxu1 %v3157_v57 }
  0x58   :  { %2091 = vmatmul.mubr.msk.f32.gmra.mxu0 %vm131_vm0, %v100_v44  ;;  %494 = vmatprep.subr.mxu0 %v3111_v45 }
  0x59   :  { %495 = vmatpush1.msra.mxu0 %v3114_v46  ;;  %262 = vmatprep.mubr.f32.mxu0 %v3985_v0 }
  0x5a   :  { %496 = vmatprep.subr.mxu0 %v3118_v47  ;;  %2303 = vmatprep.subr.mxu1 %v3985_v0 }
  0x5b   :  { %497 = vmatpush1.msra.mxu0 %v3126_v49  ;;  %2288 = vmatprep.mubr.msk.f32.mxu1 %vm131_vm0, %v3022_v21  ;;  %v116_v21 = vlaneseq }
  0x5c   :  { %2092 = vmatmul.mubr.msk.f32.gmra.mxu0 %vm131_vm0, %v101_v50  ;;  %498 = vmatprep.subr.mxu0 %v3133_v51 }
  0x5d   :  { %499 = vmatpush1.msra.mxu0 %v3141_v53  ;;  %534 = vmatprep.mubr.f32.mxu0 %v3985_v0  ;;  %v3306_v25 = vshrl.u32 %v116_v21, 7 }
  0x5e   :  { %500 = vmatprep.subr.mxu0 %v3145_v54  ;;  %2304 = vmatpush3.msra.mxu1 %v3163_v58 }
  0x5f   :  { %501 = vmatpush1.msra.mxu0 %v3152_v56  ;;  %635 = vperm.xlu0 %2599, %v633_v59   ;;  %v122_v37 = vsub.s32 1, %v3306_v25 }
  0x60   :  { %535 = vmatmul.mubr.f32.vlgmr.msra.gmra.mxu0 %v3985_v0  ;;  %2305 = vmatprep.subr.mxu1 %v3985_v0 }
  0x61   :  { %2289 = vmatmul.mubr.msk.f32.gmra.mxu1 %vm131_vm0, %v3045_v27  ;;  %645 = vmatprep.subr.mxu0 %v2984_v11  ;;  %v118_v27 = vsub.s32 0, %v3306_v25  ;;  %v123_v59 = vrot.slane %v114_v31, %v122_v37 }
  0x62   :  { %2306 = vmatpush3.msra.mxu1 %v3170_v60  ;;  %2291 = vmatprep.mubr.msk.f32.mxu1 %vm131_vm0, %v3068_v33 }
  0x63   :  { %2307 = vmatprep.subr.mxu1 %v3985_v0  ;;  %810 = vperm.xlu0 %2599, %v808_v62  }
  0x64   :  { %2308 = vmatpush3.msra.mxu1 %v3176_v61  ;;  %646 = vmatpush1.msra.mxu0 %v2986_v12 }
  0x65   :  { %2309 = vmatprep.subr.mxu1 %v3985_v0  ;;  %2292 = vmatmul.mubr.msk.f32.gmra.mxu1 %vm131_vm0, %v3091_v39 }
  0x66   :  { %2310 = vmatpush3.msra.mxu1 %v3186_v63  ;;  %2294 = vmatprep.mubr.msk.f32.mxu1 %vm131_vm0, %v100_v44  ;;  %v119_v44 = vrot.slane %v114_v31, %v118_v27 }
  0x67   :  { %2311 = vmatprep.subr.mxu1 %v3985_v0  ;;  %1335 = vperm.xlu0 %2599, %v1333_v3  }
  0x68   :  { %2312 = vmatpush3.msra.mxu1 %v3191_v2  ;;  %647 = vmatprep.subr.mxu0 %v2988_v13 }
  0x69   :  { %2313 = vmatprep.subr.mxu1 %v3985_v0  ;;  %2295 = vmatmul.mubr.msk.f32.gmra.mxu1 %vm131_vm0, %v101_v50 }
  0x6a   :  { %2314 = vmatpush3.msra.mxu1 %v3200_v4  ;;  %2329 = vmatprep.mubr.msk.f32.mxu1 %vm2867_vm5, %v3985_v0 }
  0x6b   :  { %2315 = vmatprep.subr.mxu1 %v3985_v0  ;;  %1685 = vperm.xlu0 %2599, %v1683_v6  }
  0x6c   :  { %2316 = vmatpush3.msra.mxu1 %v3205_v5  ;;  %648 = vmatpush1.msra.mxu0 %v2992_v14 }
  0x6d   :  { %2317 = vmatprep.subr.mxu1 %v3985_v0  ;;  %649 = vmatprep.subr.mxu0 %v3001_v16 }
  0x6e   :  { %2318 = vmatpush3.msra.mxu1 %v3213_v7  ;;  %650 = vmatpush1.msra.mxu0 %v3004_v17 }
  0x6f   :  { %2319 = vmatprep.subr.mxu1 %v3985_v0  ;;  %651 = vmatprep.subr.mxu0 %v3007_v18 }
  0x70   :  { %2320 = vmatpush3.msra.mxu1 %v3218_v8  ;;  %652 = vmatpush1.msra.mxu0 %v3012_v19 }
  0x71   :  { %2321 = vmatprep.subr.mxu1 %v3985_v0  ;;  %653 = vmatprep.subr.mxu0 %v3024_v22 }
  0x72   :  { %2322 = vmatpush3.msra.mxu1 %v3224_v9  ;;  %654 = vmatpush1.msra.mxu0 %v3027_v23 }
  0x73   :  { %2323 = vmatprep.subr.mxu1 %v3985_v0  ;;  %655 = vmatprep.subr.mxu0 %v3030_v24 }
  0x74   :  { %2324 = vmatpush3.msra.mxu1 %v3230_v10  ;;  %656 = vmatpush1.msra.mxu0 %v3038_v26 }
  0x75   :  { %2325 = vmatprep.subr.mxu1 %v3985_v0  ;;  %657 = vmatprep.subr.mxu0 %v3047_v28 }
  0x76   :  { %2326 = vmatpush3.msra.mxu1 %v3236_v15  ;;  %658 = vmatpush1.msra.mxu0 %v3050_v29 }
  0x77   :  { %2327 = vmatprep.subr.mxu1 %v3985_v0  ;;  %659 = vmatprep.subr.mxu0 %v3053_v30 }
  0x78   :  { %2328 = vmatpush3.msra.mxu1 %v3242_v20  ;;  %660 = vmatpush1.msra.mxu0 %v3061_v32 }
  0x79   :  { %2330 = vmatmul.mubr.f32.vlgmr.msra.gmra.mxu1 %v3985_v0  ;;  %2332 = vmatprep.subr.mxu1 %v3985_v0 }
  0x7a   :  { %2333 = vmatpush3.msra.mxu1 %v3122_v48  ;;  %661 = vmatprep.subr.mxu0 %v3070_v34 }
  0x7b   :  { %2334 = vmatprep.subr.mxu1 %v3985_v0  ;;  %662 = vmatpush1.msra.mxu0 %v3073_v35 }
  0x7c   :  { %2335 = vmatpush3.msra.mxu1 %v3148_v55  ;;  %663 = vmatprep.subr.mxu0 %v3076_v36 }
  0x7d   :  { %2336 = vmatprep.subr.mxu1 %v3985_v0  ;;  %664 = vmatpush1.msra.mxu0 %v3084_v38 }
  0x7e   :  { %2337 = vmatpush3.msra.mxu1 %v3157_v57  ;;  %665 = vmatprep.subr.mxu0 %v3093_v40 }
  0x7f   :  { %2338 = vmatprep.subr.mxu1 %v3985_v0  ;;  %666 = vmatpush1.msra.mxu0 %v3096_v41 }
  0x80   :  { %2339 = vmatpush3.msra.mxu1 %v3163_v58  ;;  %667 = vmatprep.subr.mxu0 %v3099_v42 }
  0x81   :  { %2340 = vmatprep.subr.mxu1 %v3985_v0  ;;  %668 = vmatpush1.msra.mxu0 %v3104_v43 }
  0x82   :  { %2341 = vmatpush3.msra.mxu1 %v3170_v60  ;;  %669 = vmatprep.subr.mxu0 %v3111_v45 }
  0x83   :  { %2342 = vmatprep.subr.mxu1 %v3985_v0  ;;  %670 = vmatpush1.msra.mxu0 %v3114_v46 }
  0x84   :  { %2343 = vmatpush3.msra.mxu1 %v3176_v61  ;;  %671 = vmatprep.subr.mxu0 %v3118_v47 }
  0x85   :  { %2344 = vmatprep.subr.mxu1 %v3985_v0  ;;  %672 = vmatpush1.msra.mxu0 %v3126_v49 }
  0x86   :  { %2345 = vmatpush3.msra.mxu1 %v3186_v63  ;;  %673 = vmatprep.subr.mxu0 %v3133_v51 }
  0x87   :  { %2346 = vmatprep.subr.mxu1 %v3985_v0  ;;  %674 = vmatpush1.msra.mxu0 %v3141_v53  ;;  %v126_v53 = vsub.s32 2, %v3306_v25  ;;  %v453_v25 = vld [vmem:[#allocation8] sm:$0x7] }
  0x88   :  { %2347 = vmatpush3.msra.mxu1 %v3191_v2  ;;  %675 = vmatprep.subr.mxu0 %v3145_v54 }
  0x89   :  { %2348 = vmatprep.subr.mxu1 %v3985_v0  ;;  %676 = vmatpush1.msra.mxu0 %v3152_v56 }
  0x8a   :  { %2349 = vmatpush3.msra.mxu1 %v3200_v4  ;;  %709 = vmatprep.mubr.f32.mxu0 %v3985_v0 }
  0x8b   :  { %2350 = vmatprep.subr.mxu1 %v3985_v0  ;;  %2364 = vmatprep.mubr.msk.f32.mxu1 %vm2867_vm5, %v3985_v0 }
  0x8c   :  { %2351 = vmatpush3.msra.mxu1 %v3205_v5  ;;  %820 = vmatprep.subr.mxu0 %v2984_v11 }
  0x8d   :  { %2352 = vmatprep.subr.mxu1 %v3985_v0 }
  0x8e   :  { %2353 = vmatpush3.msra.mxu1 %v3213_v7 }
  0x8f   :  { %2354 = vmatprep.subr.mxu1 %v3985_v0 }
  0x90   :  { %2355 = vmatpush3.msra.mxu1 %v3218_v8 }
  0x91   :  { %2356 = vmatprep.subr.mxu1 %v3985_v0 }
  0x92   :  { %2357 = vmatpush3.msra.mxu1 %v3224_v9 }
  0x93   :  { %2358 = vmatprep.subr.mxu1 %v3985_v0 }
  0x94   :  { %2359 = vmatpush3.msra.mxu1 %v3230_v10 }
  0x95   :  { %2360 = vmatprep.subr.mxu1 %v3985_v0 }
  0x96   :  { %2361 = vmatpush3.msra.mxu1 %v3236_v15 }
  0x97   :  { %2362 = vmatprep.subr.mxu1 %v3985_v0 }
  0x98   :  { %2363 = vmatpush3.msra.mxu1 %v3242_v20 }
  0x99   :  { %2367 = vmatprep.subr.mxu1 %v3985_v0 }
 0x100   :  { %v222_v33 = vpop.f32.mrf.mxu0 }
 0x102   :  { %v224_v39 = vpop.f32.mrf.mxu0 }
 0x104   :  { %v228_v50 = vpop.f32.mrf.mxu0 }
 0x105   :  { %v3310_v62 = vadd.f32 %v228_v50, %v119_v44 }
 0x106   :  { %v230_v3 = vpop.f32.mrf.mxu0 }
 0x107   :  { %4027 = vst [vmem:[#allocation28_spill] sm:$0xff] %v3310_v62  ;;  %v3312_v6 = vadd.f32 %v230_v3, %v123_v59 }
 0x108   :  { %v234_v1 = vpop.f32.mrf.mxu0 }
 0x109   :  { %4028 = vst [vmem:[#allocation29_spill] sm:$0xff] %v3312_v6  ;;  %v3314_v0 = vadd.f32 %v234_v1, %v119_v44  ;;  %v127_v1 = vrot.slane %v114_v31, %v126_v53 }
 0x10a   :  { %v236_v21 = vpop.f32.mrf.mxu0 }
 0x10b   :  { %4029 = vst [vmem:[#allocation30_spill] sm:$0xff] %v3314_v0  ;;  %v3316_v52 = vadd.f32 %v236_v21, %v123_v59 }
 0x10c   :  { %v240_v11 = vpop.f32.mrf.mxu0 }
 0x10d   :  { %4030 = vst [vmem:[#allocation31_spill] sm:$0xff] %v3316_v52  ;;  %v3318_v20 = vadd.f32 %v240_v11, %v119_v44 }
 0x10e   :  { %v242_v56 = vpop.f32.mrf.mxu0  ;;  %v2287_v11 = vpop.f32.mrf.mxu1 }
 0x10f   :  { %4031 = vst [vmem:[#allocation32_spill] sm:$0xff] %v3318_v20  ;;  %v3320_v54 = vadd.f32 %v242_v56, %v123_v59  ;;  %v3331_v51 = vadd.f32 %v2287_v11, %v127_v1  ;;  %v3344_v11 = vrot.slane %v453_v25, %v122_v37 }
 0x110   :  { %v246_v15 = vpop.f32.mrf.mxu0 }
 0x111   :  { %4032 = vst [vmem:[#allocation33_spill] sm:$0xff] %v3320_v54  ;;  %v3323_v50 = vadd.f32 %v246_v15, %v119_v44  ;;  %4037 = vst [vmem:[#allocation38_spill] sm:$0xff] %v3331_v51 }
 0x112   :  { %v248_v62 = vpop.f32.mrf.mxu0 }
 0x113   :  { %4033 = vst [vmem:[#allocation34_spill] sm:$0xff] %v3323_v50  ;;  %v3325_v3 = vadd.f32 %v248_v62, %v123_v59 }
 0x114   :  { %v252_v6 = vpop.f32.mrf.mxu0 }
 0x115   :  { %4034 = vst [vmem:[#allocation35_spill] sm:$0xff] %v3325_v3  ;;  %v3327_v0 = vadd.f32 %v252_v6, %v119_v44  ;;  %v3339_v3 = vrot.slane %v453_v25, %v118_v27 }
 0x116   :  { %v254_v21 = vpop.f32.mrf.mxu0 }
 0x117   :  { %4035 = vst [vmem:[#allocation36_spill] sm:$0xff] %v3327_v0  ;;  %v3329_v52 = vadd.f32 %v254_v21, %v123_v59  ;;  %4041 = vst [vmem:[#allocation42_spill] sm:$0xff] %v3339_v3 }
 0x118   :  { %v258_v20 = vpop.f32.mrf.mxu0 }
 0x119   :  { %4036 = vst [vmem:[#allocation37_spill] sm:$0xff] %v3329_v52  ;;  %v3333_v56 = vadd.f32 %v258_v20, %v119_v44  ;;  %v223_v52 = vadd.f32 %v222_v33, %v119_v44  ;;  %v335_v20 = vpop.f32.mrf.mxu1 }
 0x11a   :  { %v260_v54 = vpop.f32.mrf.mxu0 }
 0x11b   :  { %4038 = vst [vmem:[#allocation39_spill] sm:$0xff] %v3333_v56  ;;  %v3335_v15 = vadd.f32 %v260_v54, %v123_v59 }
 0x11c   :  { %v264_v50 = vpop.f32.mrf.mxu0 }
 0x11d   :  { %4039 = vst [vmem:[#allocation40_spill] sm:$0xff] %v3335_v15  ;;  %v3337_v62 = vadd.f32 %v264_v50, %v119_v44 }
 0x11e   :  { %v266_v31 = vpop.f32.mrf.mxu0 }
 0x11f   :  { %4040 = vst [vmem:[#allocation41_spill] sm:$0xff] %v3337_v62  ;;  %v3341_v6 = vadd.f32 %v266_v31, %v123_v59  ;;  %v225_v31 = vadd.f32 %v224_v39, %v123_v59  ;;  %v3359_v59 = vrot.slane %v453_v25, %v126_v53 }
 0x120   :  { %v536_v21 = vpop.f32.mrf.mxu0 }
 0x121   :  { %4042 = vst [vmem:[#allocation43_spill] sm:$0xff] %v3341_v6  ;;  %v537_v0 = vadd.f32 %v536_v21, %v3339_v3  ;;  %v2290_v10 = vpop.f32.mrf.mxu1 }
 0x122   :  { %v538_v56 = vpop.f32.mrf.mxu0  ;;  %v3346_v54 = vadd.f32 %v2290_v10, %v127_v1 }
 0x123   :  { %v611_v51 = vadd.f32 %v537_v0, %v223_v52  ;;  %v539_v50 = vadd.f32 %v538_v56, %v3344_v11  ;;  %v345_v27 = vpop.f32.mrf.mxu1 }
 0x124   :  { %4043 = vst [vmem:[#allocation44_spill] sm:$0xff] %v3346_v54  ;;  %v3349_v62 = vadd.f32 %v345_v27, %v127_v1 }
 0x125   :  { %v2101_v15 = vmul.f32 -1.442695, %v611_v51  ;;  %v2293_v6 = vpop.f32.mrf.mxu1  ;;  %v618_v44 = vadd.f32 %v539_v50, %v225_v31 }
 0x126   :  { %4044 = vst [vmem:[#allocation45_spill] sm:$0xff] %v3349_v62  ;;  %v3351_v33 = vadd.f32 %v2293_v6, %v127_v1 }
 0x127   :  { %2601 = vpow2.f32 %v2101_v15  ;;  %v355_v37 = vpop.f32.mrf.mxu1  ;;  %v2102_v52 = vmul.f32 -1.442695, %v618_v44 }
 0x128   :  { %4045 = vst [vmem:[#allocation46_spill] sm:$0xff] %v3351_v33  ;;  %v3353_v21 = vadd.f32 %v355_v37, %v127_v1  ;;  %v636_v33 = vpop.permute.xlu0 %635 }
 0x129   :  { %v2296_v3 = vpop.f32.mrf.mxu1  ;;  %2603 = vpow2.f32 %v2102_v52  ;;  %vm637_vm6 = vcmp.eq.s32.totalorder %v636_v33, 1  ;;  %v4051_v33 = vld [vmem:[#allocation20_spill] sm:$0xff] }
 0x12a   :  { %4046 = vst [vmem:[#allocation47_spill] sm:$0xff] %v3353_v21  ;;  %v3355_v0 = vadd.f32 %v2296_v3, %v127_v1  ;;  %v336_v3 = vadd.f32 %v335_v20, %v127_v1  ;;  %v4050_v20 = vld [vmem:[#allocation25_spill] sm:$0xff] }
 0x12b   :  { %v365_v10 = vpop.f32.mrf.mxu1 }
 0x12c   :  { %4047 = vst [vmem:[#allocation48_spill] sm:$0xff] %v3355_v0  ;;  %v3357_v51 = vadd.f32 %v365_v10, %v127_v1  ;;  %v4049_v1 = vmov 0.0  }
 0x12e   :  { %4048 = vst [vmem:[#allocation49_spill] sm:$0xff] %v3357_v51 }
 0x134   :  { %v2602_v56 = vpop.eup %2601 }
 0x135   :  { %v615_v27 = vadd.f32 1.0, %v2602_v56 }
 0x136   :  { %v2604_v6 = vpop.eup %2603 }
 0x137   :  { %2605 = vrcp.f32 %v615_v27  ;;  %v622_v50 = vadd.f32 1.0, %v2604_v6  ;;  %v4056_v6 = vld [vmem:[#allocation27_spill] sm:$0xff] }
 0x139   :  { %v607_v39 = vpop.f32.mrf.mxu1  ;;  %2607 = vrcp.f32 %v622_v50  ;;  %v4057_v50 = vld [vmem:[#allocation19_spill] sm:$0xff] }
 0x13a   :  { %v608_v31 = vadd.f32 %v607_v39, %v3359_v59  ;;  %v4054_v39 = vld [vmem:[#allocation23_spill] sm:$0xff] }
 0x13b   :  { %v2331_v15 = vpop.f32.mrf.mxu1 }
 0x13c   :  { %v4055_v15 = vld [vmem:[#allocation24_spill] sm:$0xff] }
 0x144   :  { %v2606_v37 = vpop.eup %2605 }
 0x145   :  { %v625_v0 = vmul.f32 %v2606_v37, %v608_v31  ;;  %v4058_v31 = vld [vmem:[#allocation21_spill] sm:$0xff]  ;;  %v4059_v37 = vmov 0  }
 0x146   :  { %v2608_v10 = vpop.eup %2607  ;;  %vm982_vm7 = vcmp.gt.s32.totalorder %v4058_v31, 2  ;;  %vm1157_vm8 = vcmp.gt.s32.totalorder %v4058_v31, 3  ;;  %vm1507_vm9 = vcmp.gt.s32.totalorder %v4058_v31, 5  ;;  %vm1857_vm10 = vcmp.gt.s32.totalorder %v4058_v31, 7 }
 0x147   :  { %v626_v44 = vadd.f32 %v625_v0, %v336_v3  ;;  %v628_v51 = vsub.f32 1.0, %v2608_v10  ;;  %v630_v27 = vmul.f32 0.0, %v2608_v10  ;;  %v4052_v0 = vld [vmem:[#allocation22_spill] sm:$0xff]  ;;  %v983_v3 = vsel %vm982_vm7, 1, %v4059_v37 }
 0x148   :  { %985 = vperm.xlu1 %2600, %v983_v3   ;;  %v1508_v10 = vsel %vm1507_vm9, 1, %v4059_v37  ;;  %v4061_v3 = vld [vmem:[#allocation28_spill] sm:$0xff] }
 0x149   :  { %2609 = vtanh.f32 %v626_v44  ;;  %v1158_v44 = vsel %vm1157_vm8, 1, %v4059_v37 }
 0x14c   :  { %1160 = vperm.xlu1 %2600, %v1158_v44   ;;  %v4062_v44 = vld [vmem:[#allocation29_spill] sm:$0xff] }
 0x150   :  { %1510 = vperm.xlu1 %2600, %v1508_v10  }
 0x156   :  { %v2610_v52 = vpop.eup %2609 }
 0x157   :  { %v629_v56 = vmul.f32 %v2610_v52, %v628_v51  ;;  %v4053_v51 = vld [vmem:[#allocation26_spill] sm:$0xff]  ;;  %v1858_v52 = vsel %vm1857_vm10, 1, %v4059_v37 }
 0x158   :  { %1860 = vperm.xlu1 %2600, %v1858_v52  }
 0x159   :  { %v631_v53 = vadd.f32 %v630_v27, %v629_v56 }
 0x15b   :  { %v3362_v25 = vsel %vm637_vm6, %v631_v53, 0.0  ;;  %2103 = vmatmul.mubr.msk.f32.vlgmr.msra.gmra.mxu0 %vm637_vm6, %v631_v53  ;;  %2365 = vmatmul.mubr.msk.f32.vlgmr.msra.gmra.mxu1 %vm637_vm6, %v631_v53  ;;  %v4060_v53 = vld [vmem:[#allocation42_spill] sm:$0xff] }
 0x15c   :  { %821 = vmatpush1.msra.mxu0 %v2986_v12  ;;  %2368 = vmatpush3.msra.mxu1 %v3122_v48 }
 0x15d   :  { %822 = vmatprep.subr.mxu0 %v2988_v13  ;;  %2369 = vmatprep.subr.mxu1 %v4049_v1 }
 0x15e   :  { %823 = vmatpush1.msra.mxu0 %v2992_v14  ;;  %2370 = vmatpush3.msra.mxu1 %v3148_v55 }
 0x15f   :  { %824 = vmatprep.subr.mxu0 %v3001_v16  ;;  %2371 = vmatprep.subr.mxu1 %v4049_v1 }
 0x160   :  { %825 = vmatpush1.msra.mxu0 %v3004_v17  ;;  %2372 = vmatpush3.msra.mxu1 %v3157_v57 }
 0x161   :  { %826 = vmatprep.subr.mxu0 %v3007_v18  ;;  %2373 = vmatprep.subr.mxu1 %v4049_v1 }
 0x162   :  { %827 = vmatpush1.msra.mxu0 %v3012_v19  ;;  %2374 = vmatpush3.msra.mxu1 %v3163_v58 }
 0x163   :  { %828 = vmatprep.subr.mxu0 %v3024_v22  ;;  %2375 = vmatprep.subr.mxu1 %v4049_v1 }
 0x164   :  { %829 = vmatpush1.msra.mxu0 %v3027_v23  ;;  %2376 = vmatpush3.msra.mxu1 %v3170_v60 }
 0x165   :  { %830 = vmatprep.subr.mxu0 %v3030_v24  ;;  %2377 = vmatprep.subr.mxu1 %v4049_v1 }
 0x166   :  { %831 = vmatpush1.msra.mxu0 %v3038_v26  ;;  %2378 = vmatpush3.msra.mxu1 %v3176_v61 }
 0x167   :  { %832 = vmatprep.subr.mxu0 %v3047_v28  ;;  %2379 = vmatprep.subr.mxu1 %v4049_v1 }
 0x168   :  { %833 = vmatpush1.msra.mxu0 %v3050_v29  ;;  %2380 = vmatpush3.msra.mxu1 %v3186_v63 }
 0x169   :  { %834 = vmatprep.subr.mxu0 %v3053_v30  ;;  %2381 = vmatprep.subr.mxu1 %v4049_v1 }
 0x16a   :  { %835 = vmatpush1.msra.mxu0 %v3061_v32  ;;  %2382 = vmatpush3.msra.mxu1 %v3191_v2 }
 0x16b   :  { %836 = vmatprep.subr.mxu0 %v3070_v34  ;;  %2383 = vmatprep.subr.mxu1 %v4049_v1 }
 0x16c   :  { %837 = vmatpush1.msra.mxu0 %v3073_v35  ;;  %2384 = vmatpush3.msra.mxu1 %v3200_v4 }
 0x16d   :  { %838 = vmatprep.subr.mxu0 %v3076_v36  ;;  %2385 = vmatprep.subr.mxu1 %v4049_v1 }
 0x16e   :  { %839 = vmatpush1.msra.mxu0 %v3084_v38  ;;  %2386 = vmatpush3.msra.mxu1 %v3205_v5 }
 0x16f   :  { %840 = vmatprep.subr.mxu0 %v3093_v40  ;;  %2387 = vmatprep.subr.mxu1 %v4049_v1 }
 0x170   :  { %841 = vmatpush1.msra.mxu0 %v3096_v41  ;;  %2388 = vmatpush3.msra.mxu1 %v3213_v7 }
 0x171   :  { %842 = vmatprep.subr.mxu0 %v3099_v42  ;;  %2389 = vmatprep.subr.mxu1 %v4049_v1 }
 0x172   :  { %843 = vmatpush1.msra.mxu0 %v3104_v43  ;;  %2390 = vmatpush3.msra.mxu1 %v3218_v8 }
 0x173   :  { %844 = vmatprep.subr.mxu0 %v3111_v45  ;;  %2391 = vmatprep.subr.mxu1 %v4049_v1 }
 0x174   :  { %845 = vmatpush1.msra.mxu0 %v3114_v46  ;;  %2392 = vmatpush3.msra.mxu1 %v3224_v9 }
 0x175   :  { %846 = vmatprep.subr.mxu0 %v3118_v47  ;;  %2393 = vmatprep.subr.mxu1 %v4049_v1 }
 0x176   :  { %847 = vmatpush1.msra.mxu0 %v3126_v49  ;;  %2394 = vmatpush3.msra.mxu1 %v4050_v20 }
 0x177   :  { %848 = vmatprep.subr.mxu0 %v4051_v33  ;;  %2395 = vmatprep.subr.mxu1 %v4049_v1 }
 0x178   :  { %849 = vmatpush1.msra.mxu0 %v4052_v0  ;;  %2396 = vmatpush3.msra.mxu1 %v4053_v51 }
 0x179   :  { %850 = vmatprep.subr.mxu0 %v4054_v39  ;;  %2397 = vmatprep.subr.mxu1 %v4049_v1 }
 0x17a   :  { %851 = vmatpush1.msra.mxu0 %v4055_v15  ;;  %884 = vmatprep.mubr.f32.mxu0 %v4049_v1 }
 0x17b   :  { %2398 = vmatpush3.msra.mxu1 %v4056_v6  ;;  %2399 = vmatprep.mubr.msk.f32.mxu1 %vm2867_vm5, %v4049_v1 }
 0x17c   :  { %995 = vmatprep.subr.mxu0 %v4057_v50  ;;  %2402 = vmatprep.subr.mxu1 %v4049_v1 }
 0x21b   :  { %v711_v56 = vpop.f32.mrf.mxu0  ;;  %v782_v27 = vpop.f32.mrf.mxu1 }
 0x21c   :  { %v712_v50 = vadd.f32 %v711_v56, %v4060_v53  ;;  %v783_v56 = vadd.f32 %v782_v27, %v3359_v59 }
 0x21d   :  { %v713_v21 = vpop.f32.mrf.mxu0  ;;  %v2366_v54 = vpop.f32.mrf.mxu1 }
 0x21e   :  { %v786_v62 = vadd.f32 %v712_v50, %v4061_v3  ;;  %v714_v6 = vadd.f32 %v713_v21, %v3344_v11  ;;  %v4063_v50 = vld [vmem:[#allocation38_spill] sm:$0xff] }
 0x220   :  { %v2105_v15 = vmul.f32 -1.442695, %v786_v62  ;;  %v793_v39 = vadd.f32 %v714_v6, %v4062_v44 }
 0x222   :  { %2611 = vpow2.f32 %v2105_v15  ;;  %v2106_v51 = vmul.f32 -1.442695, %v793_v39 }
 0x224   :  { %2613 = vpow2.f32 %v2106_v51  ;;  %v811_v51 = vpop.permute.xlu0 %810 }
 0x225   :  { %vm812_vm11 = vcmp.eq.s32.totalorder %v811_v51, 1  ;;  %v3572_v51 = vld [vmem:[#allocation6 + $0xf0] sm:$0xff] }
 0x22f   :  { %v2612_v31 = vpop.eup %2611 }
 0x230   :  { %v790_v10 = vadd.f32 1.0, %v2612_v31  ;;  %v986_v31 = vpop.permute.xlu1 %985 }
 0x231   :  { %v2614_v37 = vpop.eup %2613  ;;  %vm987_vm12 = vcmp.eq.s32.totalorder %v986_v31, 1 }
 0x232   :  { %2615 = vrcp.f32 %v790_v10  ;;  %v797_v52 = vadd.f32 1.0, %v2614_v37 }
 0x234   :  { %2617 = vrcp.f32 %v797_v52 }
 0x23f   :  { %v2616_v53 = vpop.eup %2615 }
 0x240   :  { %v800_v54 = vmul.f32 %v2616_v53, %v783_v56 }
 0x241   :  { %v2618_v0 = vpop.eup %2617 }
 0x242   :  { %v801_v3 = vadd.f32 %v800_v54, %v4063_v50  ;;  %v805_v62 = vmul.f32 %v2618_v0, %v3362_v25  ;;  %v803_v21 = vsub.f32 1.0, %v2618_v0  ;;  %v3532_v54 = vld [vmem:[#allocation6 + $0x168] sm:$0xff]  ;;  %v3536_v50 = vld [vmem:[#allocation6 + $0x158] sm:$0xff] }
 0x244   :  { %2619 = vtanh.f32 %v801_v3  ;;  %v3540_v3 = vld [vmem:[#allocation6 + $0x150] sm:$0xff] }
 0x251   :  { %v2620_v15 = vpop.eup %2619 }
 0x252   :  { %v804_v39 = vmul.f32 %v2620_v15, %v803_v21  ;;  %v3548_v21 = vld [vmem:[#allocation6 + $0x138] sm:$0xff]  ;;  %v3556_v15 = vld [vmem:[#allocation6 + $0x120] sm:$0xff] }
 0x254   :  { %v806_v6 = vadd.f32 %v805_v62, %v804_v39  ;;  %v3544_v62 = vld [vmem:[#allocation6 + $0x140] sm:$0xff]  ;;  %v3564_v39 = vld [vmem:[#allocation6 + $0x108] sm:$0xff] }
 0x256   :  { %v3447_v44 = vsel %vm812_vm11, %v806_v6, %v3362_v25  ;;  %v3580_v6 = vld [vmem:[#allocation6 + $0xd8] sm:$0xff] }
 0x257   :  { %885 = vmatmul.mubr.f32.vlgmr.msra.gmra.mxu0 %v3447_v44  ;;  %2400 = vmatmul.mubr.f32.vlgmr.msra.gmra.mxu1 %v3447_v44 }
 0x258   :  { %996 = vmatpush1.msra.mxu0 %v2986_v12  ;;  %2403 = vmatpush3.msra.mxu1 %v3122_v48  ;;  %v4064_v12 = vld [vmem:[#allocation22_spill] sm:$0xff] }
 0x259   :  { %997 = vmatprep.subr.mxu0 %v2988_v13  ;;  %2404 = vmatprep.subr.mxu1 %v4049_v1  ;;  %v4065_v13 = vld [vmem:[#allocation26_spill] sm:$0xff] }
 0x25a   :  { %998 = vmatpush1.msra.mxu0 %v2992_v14  ;;  %2405 = vmatpush3.msra.mxu1 %v3148_v55  ;;  %v4066_v14 = vld [vmem:[#allocation23_spill] sm:$0xff] }
 0x25b   :  { %999 = vmatprep.subr.mxu0 %v3001_v16  ;;  %2406 = vmatprep.subr.mxu1 %v4049_v1  ;;  %v4067_v16 = vld [vmem:[#allocation24_spill] sm:$0xff] }
 0x25c   :  { %1000 = vmatpush1.msra.mxu0 %v3004_v17  ;;  %2407 = vmatpush3.msra.mxu1 %v3157_v57  ;;  %v4068_v17 = vld [vmem:[#allocation27_spill] sm:$0xff] }
 0x25d   :  { %1001 = vmatprep.subr.mxu0 %v3007_v18  ;;  %2408 = vmatprep.subr.mxu1 %v4049_v1  ;;  %v3516_v18 = vld [vmem:[#allocation6 + $0x170] sm:$0xff] }
 0x25e   :  { %1002 = vmatpush1.msra.mxu0 %v3012_v19  ;;  %2409 = vmatpush3.msra.mxu1 %v3163_v58  ;;  %4069 = vst [vmem:[#allocation25_spill] sm:$0xff] %v3516_v18 }
 0x25f   :  { %1003 = vmatprep.subr.mxu0 %v3024_v22  ;;  %2410 = vmatprep.subr.mxu1 %v4049_v1 }
 0x260   :  { %1004 = vmatpush1.msra.mxu0 %v3027_v23  ;;  %2411 = vmatpush3.msra.mxu1 %v3170_v60  ;;  %v4070_v23 = vld [vmem:[#allocation42_spill] sm:$0xff] }
 0x261   :  { %1005 = vmatprep.subr.mxu0 %v3030_v24  ;;  %2412 = vmatprep.subr.mxu1 %v4049_v1 }
 0x262   :  { %1006 = vmatpush1.msra.mxu0 %v3038_v26  ;;  %2413 = vmatpush3.msra.mxu1 %v3176_v61 }
 0x263   :  { %1007 = vmatprep.subr.mxu0 %v3047_v28  ;;  %2414 = vmatprep.subr.mxu1 %v4049_v1 }
 0x264   :  { %1008 = vmatpush1.msra.mxu0 %v3050_v29  ;;  %2415 = vmatpush3.msra.mxu1 %v3186_v63  ;;  %v4071_v29 = vld [vmem:[#allocation30_spill] sm:$0xff] }
 0x265   :  { %1009 = vmatprep.subr.mxu0 %v3053_v30  ;;  %2416 = vmatprep.subr.mxu1 %v4049_v1 }
 0x266   :  { %1010 = vmatpush1.msra.mxu0 %v3061_v32  ;;  %2417 = vmatpush3.msra.mxu1 %v3191_v2 }
 0x267   :  { %1011 = vmatprep.subr.mxu0 %v3070_v34  ;;  %2418 = vmatprep.subr.mxu1 %v4049_v1 }
 0x268   :  { %1012 = vmatpush1.msra.mxu0 %v3073_v35  ;;  %2419 = vmatpush3.msra.mxu1 %v3200_v4  ;;  %v4072_v35 = vld [vmem:[#allocation31_spill] sm:$0xff] }
 0x269   :  { %1013 = vmatprep.subr.mxu0 %v3076_v36  ;;  %2420 = vmatprep.subr.mxu1 %v4049_v1 }
 0x26a   :  { %1014 = vmatpush1.msra.mxu0 %v3084_v38  ;;  %2421 = vmatpush3.msra.mxu1 %v3205_v5 }
 0x26b   :  { %1015 = vmatprep.subr.mxu0 %v3093_v40  ;;  %2422 = vmatprep.subr.mxu1 %v4049_v1 }
 0x26c   :  { %1016 = vmatpush1.msra.mxu0 %v3096_v41  ;;  %2423 = vmatpush3.msra.mxu1 %v3213_v7 }
 0x26d   :  { %1017 = vmatprep.subr.mxu0 %v3099_v42  ;;  %2424 = vmatprep.subr.mxu1 %v4049_v1 }
 0x26e   :  { %1018 = vmatpush1.msra.mxu0 %v3104_v43  ;;  %2425 = vmatpush3.msra.mxu1 %v3218_v8 }
 0x26f   :  { %1019 = vmatprep.subr.mxu0 %v3111_v45  ;;  %2426 = vmatprep.subr.mxu1 %v4049_v1 }
 0x270   :  { %1020 = vmatpush1.msra.mxu0 %v3114_v46  ;;  %2427 = vmatpush3.msra.mxu1 %v3224_v9 }
 0x271   :  { %1021 = vmatprep.subr.mxu0 %v3118_v47  ;;  %2428 = vmatprep.subr.mxu1 %v4049_v1 }
 0x272   :  { %1022 = vmatpush1.msra.mxu0 %v3126_v49  ;;  %2429 = vmatpush3.msra.mxu1 %v4050_v20  ;;  %v4073_v49 = vld [vmem:[#allocation45_spill] sm:$0xff] }
 0x273   :  { %1023 = vmatprep.subr.mxu0 %v4051_v33  ;;  %2430 = vmatprep.subr.mxu1 %v4049_v1 }
 0x274   :  { %1024 = vmatpush1.msra.mxu0 %v4064_v12  ;;  %2431 = vmatpush3.msra.mxu1 %v4065_v13 }
 0x275   :  { %1025 = vmatprep.subr.mxu0 %v4066_v14  ;;  %2432 = vmatprep.subr.mxu1 %v4049_v1 }
 0x276   :  { %1026 = vmatpush1.msra.mxu0 %v4067_v16  ;;  %1059 = vmatprep.mubr.f32.mxu0 %v4049_v1 }
 0x277   :  { %2433 = vmatpush3.msra.mxu1 %v4068_v17  ;;  %2434 = vmatprep.mubr.msk.f32.mxu1 %vm2867_vm5, %v4049_v1 }
 0x278   :  { %1170 = vmatprep.subr.mxu0 %v3516_v18  ;;  %2437 = vmatprep.subr.mxu1 %v4049_v1 }
 0x317   :  { %v886_v19 = vpop.f32.mrf.mxu0  ;;  %v957_v22 = vpop.f32.mrf.mxu1 }
 0x318   :  { %v887_v24 = vadd.f32 %v886_v19, %v4070_v23  ;;  %v958_v45 = vadd.f32 %v957_v22, %v3359_v59  ;;  %v3596_v19 = vld [vmem:[#allocation6 + $0xa8] sm:$0xff]  ;;  %v3604_v22 = vld [vmem:[#allocation6 + $0x90] sm:$0xff] }
 0x319   :  { %v888_v26 = vpop.f32.mrf.mxu0  ;;  %v2401_v28 = vpop.f32.mrf.mxu1 }
 0x31a   :  { %v961_v30 = vadd.f32 %v887_v24, %v4071_v29  ;;  %v889_v34 = vadd.f32 %v888_v26, %v3344_v11  ;;  %v3612_v24 = vld [vmem:[#allocation6 + $0x78] sm:$0xff]  ;;  %v3620_v26 = vld [vmem:[#allocation6 + $0x60] sm:$0xff]  ;;  %v3628_v28 = vld [vmem:[#allocation6 + $0x48] sm:$0xff] }
 0x31b   :  { %v3636_v29 = vld [vmem:[#allocation6 + $0x30] sm:$0xff] }
 0x31c   :  { %v2107_v32 = vmul.f32 -1.442695, %v961_v30  ;;  %v968_v36 = vadd.f32 %v889_v34, %v4072_v35 }
 0x31e   :  { %2621 = vpow2.f32 %v2107_v32  ;;  %v2108_v38 = vmul.f32 -1.442695, %v968_v36 }
 0x320   :  { %2623 = vpow2.f32 %v2108_v38 }
 0x32b   :  { %v2622_v40 = vpop.eup %2621 }
 0x32c   :  { %v965_v41 = vadd.f32 1.0, %v2622_v40 }
 0x32d   :  { %v2624_v42 = vpop.eup %2623 }
 0x32e   :  { %2625 = vrcp.f32 %v965_v41  ;;  %v972_v43 = vadd.f32 1.0, %v2624_v42 }
 0x330   :  { %2627 = vrcp.f32 %v972_v43 }
 0x33b   :  { %v2626_v46 = vpop.eup %2625 }
 0x33c   :  { %v975_v47 = vmul.f32 %v2626_v46, %v958_v45  ;;  %v4076_v45 = vld [vmem:[#allocation44_spill] sm:$0xff] }
 0x33d   :  { %v2628_v0 = vpop.eup %2627 }
 0x33e   :  { %v976_v25 = vadd.f32 %v975_v47, %v4073_v49  ;;  %v978_v27 = vsub.f32 1.0, %v2628_v0  ;;  %v980_v37 = vmul.f32 %v2628_v0, %v3447_v44 }
 0x340   :  { %2629 = vtanh.f32 %v976_v25 }
 0x34d   :  { %v2630_v53 = vpop.eup %2629 }
 0x34e   :  { %v979_v10 = vmul.f32 %v2630_v53, %v978_v27  ;;  %v1161_v53 = vpop.permute.xlu1 %1160 }
 0x34f   :  { %vm1162_vm13 = vcmp.eq.s32.totalorder %v1161_v53, 1  ;;  %v4083_v53 = vld [vmem:[#allocation35_spill] sm:$0xff] }
 0x350   :  { %v981_v52 = vadd.f32 %v980_v37, %v979_v10  ;;  %v3666_v37 = vld [vmem:[#allocation6 + $0x178] sm:$0xff] }
 0x352   :  { %v3528_v56 = vsel %vm987_vm12, %v981_v52, %v3447_v44  ;;  %v3588_v44 = vld [vmem:[#allocation6 + $0xc0] sm:$0xff] }
 0x353   :  { %1060 = vmatmul.mubr.f32.vlgmr.msra.gmra.mxu0 %v3528_v56  ;;  %2435 = vmatmul.mubr.f32.vlgmr.msra.gmra.mxu1 %v3528_v56  ;;  %v3672_v52 = vld [vmem:[#allocation6 + $0x160] sm:$0xff] }
 0x354   :  { %1171 = vmatpush1.msra.mxu0 %v3532_v54  ;;  %2438 = vmatpush3.msra.mxu1 %v3122_v48  ;;  %v3552_v48 = vld [vmem:[#allocation6 + $0x128] sm:$0xff] }
 0x355   :  { %1172 = vmatprep.subr.mxu0 %v3536_v50  ;;  %2439 = vmatprep.subr.mxu1 %v4049_v1 }
 0x356   :  { %1173 = vmatpush1.msra.mxu0 %v3540_v3  ;;  %2440 = vmatpush3.msra.mxu1 %v3148_v55  ;;  %v3560_v55 = vld [vmem:[#allocation6 + $0x110] sm:$0xff] }
 0x357   :  { %1174 = vmatprep.subr.mxu0 %v3544_v62  ;;  %2441 = vmatprep.subr.mxu1 %v4049_v1 }
 0x358   :  { %1175 = vmatpush1.msra.mxu0 %v3548_v21  ;;  %2442 = vmatpush3.msra.mxu1 %v3157_v57  ;;  %v3568_v57 = vld [vmem:[#allocation6 + $0xf8] sm:$0xff] }
 0x359   :  { %1176 = vmatprep.subr.mxu0 %v3552_v48  ;;  %2443 = vmatprep.subr.mxu1 %v4049_v1 }
 0x35a   :  { %1177 = vmatpush1.msra.mxu0 %v3556_v15  ;;  %2444 = vmatpush3.msra.mxu1 %v3163_v58  ;;  %v3576_v58 = vld [vmem:[#allocation6 + $0xe0] sm:$0xff] }
 0x35b   :  { %1178 = vmatprep.subr.mxu0 %v3560_v55  ;;  %2445 = vmatprep.subr.mxu1 %v4049_v1 }
 0x35c   :  { %1179 = vmatpush1.msra.mxu0 %v3564_v39  ;;  %2446 = vmatpush3.msra.mxu1 %v3170_v60  ;;  %v3584_v60 = vld [vmem:[#allocation6 + $0xc8] sm:$0xff] }
 0x35d   :  { %1180 = vmatprep.subr.mxu0 %v3568_v57  ;;  %2447 = vmatprep.subr.mxu1 %v4049_v1 }
 0x35e   :  { %1181 = vmatpush1.msra.mxu0 %v3572_v51  ;;  %2448 = vmatpush3.msra.mxu1 %v3176_v61  ;;  %v3592_v61 = vld [vmem:[#allocation6 + $0xb0] sm:$0xff] }
 0x35f   :  { %1182 = vmatprep.subr.mxu0 %v3576_v58  ;;  %2449 = vmatprep.subr.mxu1 %v4049_v1 }
 0x360   :  { %1183 = vmatpush1.msra.mxu0 %v3580_v6  ;;  %2450 = vmatpush3.msra.mxu1 %v3186_v63  ;;  %v3600_v63 = vld [vmem:[#allocation6 + $0x98] sm:$0xff] }
 0x361   :  { %1184 = vmatprep.subr.mxu0 %v3584_v60  ;;  %2451 = vmatprep.subr.mxu1 %v4049_v1 }
 0x362   :  { %1185 = vmatpush1.msra.mxu0 %v3588_v44  ;;  %2452 = vmatpush3.msra.mxu1 %v3191_v2  ;;  %v3608_v2 = vld [vmem:[#allocation6 + $0x80] sm:$0xff] }
 0x363   :  { %1186 = vmatprep.subr.mxu0 %v3592_v61  ;;  %2453 = vmatprep.subr.mxu1 %v4049_v1 }
 0x364   :  { %1187 = vmatpush1.msra.mxu0 %v3596_v19  ;;  %2454 = vmatpush3.msra.mxu1 %v3200_v4  ;;  %v3616_v4 = vld [vmem:[#allocation6 + $0x68] sm:$0xff] }
 0x365   :  { %1188 = vmatprep.subr.mxu0 %v3600_v63  ;;  %2455 = vmatprep.subr.mxu1 %v4049_v1 }
 0x366   :  { %1189 = vmatpush1.msra.mxu0 %v3604_v22  ;;  %2456 = vmatpush3.msra.mxu1 %v3205_v5  ;;  %v3624_v5 = vld [vmem:[#allocation6 + $0x50] sm:$0xff] }
 0x367   :  { %1190 = vmatprep.subr.mxu0 %v3608_v2  ;;  %2457 = vmatprep.subr.mxu1 %v4049_v1 }
 0x368   :  { %1191 = vmatpush1.msra.mxu0 %v3612_v24  ;;  %2458 = vmatpush3.msra.mxu1 %v3213_v7  ;;  %v3632_v7 = vld [vmem:[#allocation6 + $0x38] sm:$0xff] }
 0x369   :  { %1192 = vmatprep.subr.mxu0 %v3616_v4  ;;  %2459 = vmatprep.subr.mxu1 %v4049_v1 }
 0x36a   :  { %1193 = vmatpush1.msra.mxu0 %v3620_v26  ;;  %2460 = vmatpush3.msra.mxu1 %v3218_v8 }
 0x36b   :  { %1194 = vmatprep.subr.mxu0 %v3624_v5  ;;  %2461 = vmatprep.subr.mxu1 %v4049_v1 }
 0x36c   :  { %1195 = vmatpush1.msra.mxu0 %v3628_v28  ;;  %2462 = vmatpush3.msra.mxu1 %v3224_v9 }
 0x36d   :  { %1196 = vmatprep.subr.mxu0 %v3632_v7  ;;  %2463 = vmatprep.subr.mxu1 %v4049_v1 }
 0x36e   :  { %1197 = vmatpush1.msra.mxu0 %v3636_v29  ;;  %2464 = vmatpush3.msra.mxu1 %v4050_v20 }
 0x36f   :  { %1198 = vmatprep.subr.mxu0 %v4051_v33  ;;  %2465 = vmatprep.subr.mxu1 %v4049_v1 }
 0x370   :  { %1199 = vmatpush1.msra.mxu0 %v4064_v12  ;;  %2466 = vmatpush3.msra.mxu1 %v4065_v13  ;;  %v4074_v13 = vld [vmem:[#allocation32_spill] sm:$0xff] }
 0x371   :  { %1200 = vmatprep.subr.mxu0 %v4066_v14  ;;  %2467 = vmatprep.subr.mxu1 %v4049_v1 }
 0x372   :  { %1201 = vmatpush1.msra.mxu0 %v4067_v16  ;;  %1234 = vmatprep.mubr.f32.mxu0 %v4049_v1 }
 0x373   :  { %2468 = vmatpush3.msra.mxu1 %v4068_v17  ;;  %2469 = vmatprep.mubr.msk.f32.mxu1 %vm2867_vm5, %v4049_v1  ;;  %v4075_v17 = vld [vmem:[#allocation33_spill] sm:$0xff] }
 0x374   :  { %1345 = vmatprep.subr.mxu0 %v3516_v18  ;;  %2472 = vmatprep.subr.mxu1 %v4049_v1 }
 0x413   :  { %v1061_v8 = vpop.f32.mrf.mxu0  ;;  %v1132_v9 = vpop.f32.mrf.mxu1 }
 0x414   :  { %v1062_v20 = vadd.f32 %v1061_v8, %v4070_v23  ;;  %v1133_v41 = vadd.f32 %v1132_v9, %v3359_v59  ;;  %v3684_v8 = vld [vmem:[#allocation6 + $0x130] sm:$0xff]  ;;  %v3690_v9 = vld [vmem:[#allocation6 + $0x118] sm:$0xff] }
 0x415   :  { %v1063_v33 = vpop.f32.mrf.mxu0  ;;  %v2436_v12 = vpop.f32.mrf.mxu1 }
 0x416   :  { %v1136_v14 = vadd.f32 %v1062_v20, %v4074_v13  ;;  %v1064_v30 = vadd.f32 %v1063_v33, %v3344_v11  ;;  %v3696_v20 = vld [vmem:[#allocation6 + $0x100] sm:$0xff]  ;;  %v3702_v33 = vld [vmem:[#allocation6 + $0xe8] sm:$0xff]  ;;  %v3708_v12 = vld [vmem:[#allocation6 + $0xd0] sm:$0xff] }
 0x417   :  { %v3714_v13 = vld [vmem:[#allocation6 + $0xb8] sm:$0xff] }
 0x418   :  { %v2109_v16 = vmul.f32 -1.442695, %v1136_v14  ;;  %v1143_v32 = vadd.f32 %v1064_v30, %v4075_v17  ;;  %v3720_v14 = vld [vmem:[#allocation6 + $0xa0] sm:$0xff]  ;;  %v3732_v30 = vld [vmem:[#allocation6 + $0x70] sm:$0xff]  ;;  %v3738_v17 = vld [vmem:[#allocation6 + $0x58] sm:$0xff] }
 0x41a   :  { %2631 = vpow2.f32 %v2109_v16  ;;  %v2110_v34 = vmul.f32 -1.442695, %v1143_v32  ;;  %v3726_v16 = vld [vmem:[#allocation6 + $0x88] sm:$0xff]  ;;  %v3744_v32 = vld [vmem:[#allocation6 + $0x40] sm:$0xff] }
 0x41c   :  { %2633 = vpow2.f32 %v2110_v34  ;;  %v3747_v34 = vld [vmem:[#allocation6 + $0x20] sm:$0xff] }
 0x427   :  { %v2632_v35 = vpop.eup %2631 }
 0x428   :  { %v1140_v36 = vadd.f32 1.0, %v2632_v35  ;;  %v3751_v35 = vld [vmem:[#allocation6 + $0x18] sm:$0xff] }
 0x429   :  { %v2634_v38 = vpop.eup %2633  ;;  %4077 = vst [vmem:[#allocation20_spill] sm:$0xff] %v3751_v35 }
 0x42a   :  { %2635 = vrcp.f32 %v1140_v36  ;;  %v1147_v40 = vadd.f32 1.0, %v2634_v38  ;;  %v3754_v36 = vld [vmem:[#allocation6 + $0x28] sm:$0xff] }
 0x42b   :  { %4078 = vst [vmem:[#allocation19_spill] sm:$0xff] %v3754_v36  ;;  %v3757_v38 = vld [vmem:[#allocation6 + $0x8] sm:$0xff] }
 0x42c   :  { %2637 = vrcp.f32 %v1147_v40  ;;  %4079 = vst [vmem:[#allocation21_spill] sm:$0xff] %v3757_v38  ;;  %v3761_v40 = vld [vmem:[#allocation6] sm:$0xff] }
 0x42d   :  { %4080 = vst [vmem:[#allocation28_spill] sm:$0xff] %v3761_v40 }
 0x437   :  { %v2636_v42 = vpop.eup %2635 }
 0x438   :  { %v1150_v43 = vmul.f32 %v2636_v42, %v1133_v41  ;;  %v3765_v41 = vld [vmem:[#allocation6 + $0x10] sm:$0xff] }
 0x439   :  { %v2638_v47 = vpop.eup %2637  ;;  %4081 = vst [vmem:[#allocation29_spill] sm:$0xff] %v3765_v41 }
 0x43a   :  { %v1151_v46 = vadd.f32 %v1150_v43, %v4076_v45  ;;  %v1153_v49 = vsub.f32 1.0, %v2638_v47  ;;  %v1155_v27 = vmul.f32 %v2638_v47, %v3528_v56 }
 0x43c   :  { %2639 = vtanh.f32 %v1151_v46 }
 0x449   :  { %v2640_v25 = vpop.eup %2639 }
 0x44a   :  { %v1154_v0 = vmul.f32 %v2640_v25, %v1153_v49  ;;  %v4082_v49 = vld [vmem:[#allocation34_spill] sm:$0xff] }
 0x44c   :  { %v1156_v31 = vadd.f32 %v1155_v27, %v1154_v0 }
 0x44e   :  { %v3661_v10 = vsel %vm1162_vm13, %v1156_v31, %v3528_v56  ;;  %v3678_v56 = vld [vmem:[#allocation6 + $0x148] sm:$0xff] }
 0x44f   :  { %1235 = vmatmul.mubr.f32.vlgmr.msra.gmra.mxu0 %v3661_v10  ;;  %2470 = vmatmul.mubr.f32.vlgmr.msra.gmra.mxu1 %v3661_v10 }
 0x450   :  { %1346 = vmatpush1.msra.mxu0 %v3532_v54  ;;  %2473 = vmatpush3.msra.mxu1 %v3666_v37 }
 0x451   :  { %1347 = vmatprep.subr.mxu0 %v3536_v50  ;;  %2474 = vmatprep.subr.mxu1 %v4049_v1 }
 0x452   :  { %1348 = vmatpush1.msra.mxu0 %v3540_v3  ;;  %2475 = vmatpush3.msra.mxu1 %v3672_v52 }
 0x453   :  { %1349 = vmatprep.subr.mxu0 %v3544_v62  ;;  %2476 = vmatprep.subr.mxu1 %v4049_v1 }
 0x454   :  { %1350 = vmatpush1.msra.mxu0 %v3548_v21  ;;  %2477 = vmatpush3.msra.mxu1 %v3678_v56 }
 0x455   :  { %1351 = vmatprep.subr.mxu0 %v3552_v48  ;;  %2478 = vmatprep.subr.mxu1 %v4049_v1 }
 0x456   :  { %1352 = vmatpush1.msra.mxu0 %v3556_v15  ;;  %2479 = vmatpush3.msra.mxu1 %v3684_v8 }
 0x457   :  { %1353 = vmatprep.subr.mxu0 %v3560_v55  ;;  %2480 = vmatprep.subr.mxu1 %v4049_v1 }
 0x458   :  { %1354 = vmatpush1.msra.mxu0 %v3564_v39  ;;  %2481 = vmatpush3.msra.mxu1 %v3690_v9 }
 0x459   :  { %1355 = vmatprep.subr.mxu0 %v3568_v57  ;;  %2482 = vmatprep.subr.mxu1 %v4049_v1 }
 0x45a   :  { %1356 = vmatpush1.msra.mxu0 %v3572_v51  ;;  %2483 = vmatpush3.msra.mxu1 %v3696_v20 }
 0x45b   :  { %1357 = vmatprep.subr.mxu0 %v3576_v58  ;;  %2484 = vmatprep.subr.mxu1 %v4049_v1 }
 0x45c   :  { %1358 = vmatpush1.msra.mxu0 %v3580_v6  ;;  %2485 = vmatpush3.msra.mxu1 %v3702_v33 }
 0x45d   :  { %1359 = vmatprep.subr.mxu0 %v3584_v60  ;;  %2486 = vmatprep.subr.mxu1 %v4049_v1 }
 0x45e   :  { %1360 = vmatpush1.msra.mxu0 %v3588_v44  ;;  %2487 = vmatpush3.msra.mxu1 %v3708_v12 }
 0x45f   :  { %1361 = vmatprep.subr.mxu0 %v3592_v61  ;;  %2488 = vmatprep.subr.mxu1 %v4049_v1 }
 0x460   :  { %1362 = vmatpush1.msra.mxu0 %v3596_v19  ;;  %2489 = vmatpush3.msra.mxu1 %v3714_v13 }
 0x461   :  { %1363 = vmatprep.subr.mxu0 %v3600_v63  ;;  %2490 = vmatprep.subr.mxu1 %v4049_v1 }
 0x462   :  { %1364 = vmatpush1.msra.mxu0 %v3604_v22  ;;  %2491 = vmatpush3.msra.mxu1 %v3720_v14 }
 0x463   :  { %1365 = vmatprep.subr.mxu0 %v3608_v2  ;;  %2492 = vmatprep.subr.mxu1 %v4049_v1 }
 0x464   :  { %1366 = vmatpush1.msra.mxu0 %v3612_v24  ;;  %2493 = vmatpush3.msra.mxu1 %v3726_v16 }
 0x465   :  { %1367 = vmatprep.subr.mxu0 %v3616_v4  ;;  %2494 = vmatprep.subr.mxu1 %v4049_v1 }
 0x466   :  { %1368 = vmatpush1.msra.mxu0 %v3620_v26  ;;  %2495 = vmatpush3.msra.mxu1 %v3732_v30 }
 0x467   :  { %1369 = vmatprep.subr.mxu0 %v3624_v5  ;;  %2496 = vmatprep.subr.mxu1 %v4049_v1 }
 0x468   :  { %1370 = vmatpush1.msra.mxu0 %v3628_v28  ;;  %2497 = vmatpush3.msra.mxu1 %v3738_v17 }
 0x469   :  { %1371 = vmatprep.subr.mxu0 %v3632_v7  ;;  %2498 = vmatprep.subr.mxu1 %v4049_v1 }
 0x46a   :  { %1372 = vmatpush1.msra.mxu0 %v3636_v29  ;;  %2499 = vmatpush3.msra.mxu1 %v3744_v32 }
 0x46b   :  { %1373 = vmatprep.subr.mxu0 %v3747_v34  ;;  %2500 = vmatprep.subr.mxu1 %v4049_v1 }
 0x46c   :  { %1374 = vmatpush1.msra.mxu0 %v3751_v35  ;;  %2501 = vmatpush3.msra.mxu1 %v3754_v36 }
 0x46d   :  { %1375 = vmatprep.subr.mxu0 %v3757_v38  ;;  %2502 = vmatprep.subr.mxu1 %v4049_v1 }
 0x46e   :  { %1376 = vmatpush1.msra.mxu0 %v3761_v40  ;;  %1409 = vmatprep.mubr.f32.mxu0 %v4049_v1 }
 0x46f   :  { %2503 = vmatpush3.msra.mxu1 %v3765_v41  ;;  %2504 = vmatprep.mubr.msk.f32.mxu1 %vm2867_vm5, %v4049_v1 }
 0x470   :  { %1520 = vmatprep.subr.mxu0 %v3516_v18  ;;  %2507 = vmatprep.subr.mxu1 %v4049_v1 }
 0x50f   :  { %v1236_v42 = vpop.f32.mrf.mxu0  ;;  %v1307_v43 = vpop.f32.mrf.mxu1 }
 0x510   :  { %v1237_v45 = vadd.f32 %v1236_v42, %v4070_v23  ;;  %v1308_v35 = vadd.f32 %v1307_v43, %v3359_v59 }
 0x511   :  { %v1238_v46 = vpop.f32.mrf.mxu0  ;;  %v2471_v47 = vpop.f32.mrf.mxu1 }
 0x512   :  { %v1311_v25 = vadd.f32 %v1237_v45, %v4082_v49  ;;  %v1239_v27 = vadd.f32 %v1238_v46, %v3344_v11  ;;  %v4084_v47 = vld [vmem:[#allocation47_spill] sm:$0xff] }
 0x514   :  { %v2111_v0 = vmul.f32 -1.442695, %v1311_v25  ;;  %v1318_v31 = vadd.f32 %v1239_v27, %v4083_v53 }
 0x516   :  { %2641 = vpow2.f32 %v2111_v0  ;;  %v2112_v41 = vmul.f32 -1.442695, %v1318_v31 }
 0x518   :  { %2643 = vpow2.f32 %v2112_v41  ;;  %v1336_v41 = vpop.permute.xlu0 %1335 }
 0x519   :  { %vm1337_vm14 = vcmp.eq.s32.totalorder %v1336_v41, 1  ;;  %v4093_v41 = vld [vmem:[#allocation37_spill] sm:$0xff] }
 0x523   :  { %v2642_v40 = vpop.eup %2641 }
 0x524   :  { %v1315_v18 = vadd.f32 1.0, %v2642_v40  ;;  %v4090_v40 = vld [vmem:[#allocation25_spill] sm:$0xff] }
 0x525   :  { %v2644_v38 = vpop.eup %2643 }
 0x526   :  { %2645 = vrcp.f32 %v1315_v18  ;;  %v1322_v36 = vadd.f32 1.0, %v2644_v38  ;;  %v4089_v38 = vld [vmem:[#allocation29_spill] sm:$0xff] }
 0x528   :  { %2647 = vrcp.f32 %v1322_v36  ;;  %v4088_v36 = vld [vmem:[#allocation28_spill] sm:$0xff] }
 0x533   :  { %v2646_v42 = vpop.eup %2645 }
 0x534   :  { %v1325_v23 = vmul.f32 %v2646_v42, %v1308_v35  ;;  %v4087_v35 = vld [vmem:[#allocation21_spill] sm:$0xff]  ;;  %v4091_v42 = vld [vmem:[#allocation42_spill] sm:$0xff] }
 0x535   :  { %v2648_v49 = vpop.eup %2647 }
 0x536   :  { %v1326_v45 = vadd.f32 %v1325_v23, %v4084_v47  ;;  %v1328_v46 = vsub.f32 1.0, %v2648_v49  ;;  %v1330_v27 = vmul.f32 %v2648_v49, %v3661_v10  ;;  %v4085_v23 = vld [vmem:[#allocation20_spill] sm:$0xff] }
 0x538   :  { %2649 = vtanh.f32 %v1326_v45 }
 0x545   :  { %v2650_v25 = vpop.eup %2649 }
 0x546   :  { %v1329_v0 = vmul.f32 %v2650_v25, %v1328_v46  ;;  %v4092_v46 = vld [vmem:[#allocation36_spill] sm:$0xff] }
 0x548   :  { %v1331_v53 = vadd.f32 %v1330_v27, %v1329_v0 }
 0x54a   :  { %v3780_v18 = vsel %vm1337_vm14, %v1331_v53, %v3661_v10  ;;  %v4086_v10 = vld [vmem:[#allocation19_spill] sm:$0xff] }
 0x54b   :  { %1410 = vmatmul.mubr.f32.vlgmr.msra.gmra.mxu0 %v3780_v18  ;;  %2505 = vmatmul.mubr.f32.vlgmr.msra.gmra.mxu1 %v3780_v18 }
 0x54c   :  { %1521 = vmatpush1.msra.mxu0 %v3532_v54  ;;  %2508 = vmatpush3.msra.mxu1 %v3666_v37 }
 0x54d   :  { %1522 = vmatprep.subr.mxu0 %v3536_v50  ;;  %2509 = vmatprep.subr.mxu1 %v4049_v1 }
 0x54e   :  { %1523 = vmatpush1.msra.mxu0 %v3540_v3  ;;  %2510 = vmatpush3.msra.mxu1 %v3672_v52 }
 0x54f   :  { %1524 = vmatprep.subr.mxu0 %v3544_v62  ;;  %2511 = vmatprep.subr.mxu1 %v4049_v1 }
 0x550   :  { %1525 = vmatpush1.msra.mxu0 %v3548_v21  ;;  %2512 = vmatpush3.msra.mxu1 %v3678_v56 }
 0x551   :  { %1526 = vmatprep.subr.mxu0 %v3552_v48  ;;  %2513 = vmatprep.subr.mxu1 %v4049_v1 }
 0x552   :  { %1527 = vmatpush1.msra.mxu0 %v3556_v15  ;;  %2514 = vmatpush3.msra.mxu1 %v3684_v8 }
 0x553   :  { %1528 = vmatprep.subr.mxu0 %v3560_v55  ;;  %2515 = vmatprep.subr.mxu1 %v4049_v1 }
 0x554   :  { %1529 = vmatpush1.msra.mxu0 %v3564_v39  ;;  %2516 = vmatpush3.msra.mxu1 %v3690_v9 }
 0x555   :  { %1530 = vmatprep.subr.mxu0 %v3568_v57  ;;  %2517 = vmatprep.subr.mxu1 %v4049_v1 }
 0x556   :  { %1531 = vmatpush1.msra.mxu0 %v3572_v51  ;;  %2518 = vmatpush3.msra.mxu1 %v3696_v20 }
 0x557   :  { %1532 = vmatprep.subr.mxu0 %v3576_v58  ;;  %2519 = vmatprep.subr.mxu1 %v4049_v1 }
 0x558   :  { %1533 = vmatpush1.msra.mxu0 %v3580_v6  ;;  %2520 = vmatpush3.msra.mxu1 %v3702_v33 }
 0x559   :  { %1534 = vmatprep.subr.mxu0 %v3584_v60  ;;  %2521 = vmatprep.subr.mxu1 %v4049_v1 }
 0x55a   :  { %1535 = vmatpush1.msra.mxu0 %v3588_v44  ;;  %2522 = vmatpush3.msra.mxu1 %v3708_v12 }
 0x55b   :  { %1536 = vmatprep.subr.mxu0 %v3592_v61  ;;  %2523 = vmatprep.subr.mxu1 %v4049_v1 }
 0x55c   :  { %1537 = vmatpush1.msra.mxu0 %v3596_v19  ;;  %2524 = vmatpush3.msra.mxu1 %v3714_v13 }
 0x55d   :  { %1538 = vmatprep.subr.mxu0 %v3600_v63  ;;  %2525 = vmatprep.subr.mxu1 %v4049_v1 }
 0x55e   :  { %1539 = vmatpush1.msra.mxu0 %v3604_v22  ;;  %2526 = vmatpush3.msra.mxu1 %v3720_v14 }
 0x55f   :  { %1540 = vmatprep.subr.mxu0 %v3608_v2  ;;  %2527 = vmatprep.subr.mxu1 %v4049_v1 }
 0x560   :  { %1541 = vmatpush1.msra.mxu0 %v3612_v24  ;;  %2528 = vmatpush3.msra.mxu1 %v3726_v16 }
 0x561   :  { %1542 = vmatprep.subr.mxu0 %v3616_v4  ;;  %2529 = vmatprep.subr.mxu1 %v4049_v1 }
 0x562   :  { %1543 = vmatpush1.msra.mxu0 %v3620_v26  ;;  %2530 = vmatpush3.msra.mxu1 %v3732_v30 }
 0x563   :  { %1544 = vmatprep.subr.mxu0 %v3624_v5  ;;  %2531 = vmatprep.subr.mxu1 %v4049_v1 }
 0x564   :  { %1545 = vmatpush1.msra.mxu0 %v3628_v28  ;;  %2532 = vmatpush3.msra.mxu1 %v3738_v17 }
 0x565   :  { %1546 = vmatprep.subr.mxu0 %v3632_v7  ;;  %2533 = vmatprep.subr.mxu1 %v4049_v1 }
 0x566   :  { %1547 = vmatpush1.msra.mxu0 %v3636_v29  ;;  %2534 = vmatpush3.msra.mxu1 %v3744_v32 }
 0x567   :  { %1548 = vmatprep.subr.mxu0 %v3747_v34  ;;  %2535 = vmatprep.subr.mxu1 %v4049_v1 }
 0x568   :  { %1549 = vmatpush1.msra.mxu0 %v4085_v23  ;;  %2536 = vmatpush3.msra.mxu1 %v4086_v10 }
 0x569   :  { %1550 = vmatprep.subr.mxu0 %v4087_v35  ;;  %2537 = vmatprep.subr.mxu1 %v4049_v1 }
 0x56a   :  { %1551 = vmatpush1.msra.mxu0 %v4088_v36  ;;  %1584 = vmatprep.mubr.f32.mxu0 %v4049_v1 }
 0x56b   :  { %2538 = vmatpush3.msra.mxu1 %v4089_v38  ;;  %2539 = vmatprep.mubr.msk.f32.mxu1 %vm2867_vm5, %v4049_v1 }
 0x56c   :  { %1695 = vmatprep.subr.mxu0 %v4090_v40  ;;  %2542 = vmatprep.subr.mxu1 %v4049_v1 }
 0x60b   :  { %v1411_v43 = vpop.f32.mrf.mxu0  ;;  %v1482_v31 = vpop.f32.mrf.mxu1 }
 0x60c   :  { %v1412_v47 = vadd.f32 %v1411_v43, %v4091_v42  ;;  %v1483_v23 = vadd.f32 %v1482_v31, %v3359_v59  ;;  %v4104_v31 = vld [vmem:[#allocation41_spill] sm:$0xff] }
 0x60d   :  { %v1413_v45 = vpop.f32.mrf.mxu0  ;;  %v2506_v49 = vpop.f32.mrf.mxu1 }
 0x60e   :  { %v1486_v25 = vadd.f32 %v1412_v47, %v4092_v46  ;;  %v1414_v27 = vadd.f32 %v1413_v45, %v3344_v11  ;;  %v4094_v49 = vld [vmem:[#allocation46_spill] sm:$0xff] }
 0x610   :  { %v2113_v0 = vmul.f32 -1.442695, %v1486_v25  ;;  %v1493_v53 = vadd.f32 %v1414_v27, %v4093_v41 }
 0x612   :  { %2651 = vpow2.f32 %v2113_v0  ;;  %v2114_v38 = vmul.f32 -1.442695, %v1493_v53 }
 0x614   :  { %2653 = vpow2.f32 %v2114_v38  ;;  %v1511_v38 = vpop.permute.xlu1 %1510 }
 0x615   :  { %vm1512_vm15 = vcmp.eq.s32.totalorder %v1511_v38, 1 }
 0x61f   :  { %v2652_v36 = vpop.eup %2651 }
 0x620   :  { %v1490_v40 = vadd.f32 1.0, %v2652_v36 }
 0x621   :  { %v2654_v35 = vpop.eup %2653 }
 0x622   :  { %2655 = vrcp.f32 %v1490_v40  ;;  %v1497_v10 = vadd.f32 1.0, %v2654_v35  ;;  %v2119_v35 = vld [vmem:[%s3977_s8] ss:$0 sm:$0xff]  ;;  %s2869_s8 = smov [#allocation11]  }
 0x624   :  { %2657 = vrcp.f32 %v1497_v10  ;;  %v2122_v10 = vld [vmem:[%s3980_s11] ss:$0 sm:$0xff]  ;;  %s2053_s11 = sshll.u32 %s2869_s8, 4  ;;  %s2054_s11 = int_to_ptr.vmem [resolvable:$true] %s2053_s11 }
 0x625   :  { %s2809_s16 = scalar_lea.vmem %s2054_s11, 128  ;;  %p2814_p7 = scmp.lt.s32.totalorder %s2054_s11, %s2054_s11 }
 0x626   :  { %p2810_p6 = scmp.ne.s32.totalorder %s2054_s11, %s2809_s16  ;;  %p2815_p8 = scmp.lt.s32.totalorder %s2809_s16, %s2809_s16 }
 0x628   :  { %p2816_p9 = por %p2815_p8, %p2814_p7 }
 0x62a   :  { %p2817_p10 = pnand %p2816_p9, %p2810_p6 }
 0x62f   :  { %v2656_v43 = vpop.eup %2655 }
 0x630   :  { %v1500_v42 = vmul.f32 %v2656_v43, %v1483_v23 }
 0x631   :  { %v2658_v46 = vpop.eup %2657 }
 0x632   :  { %v1501_v47 = vadd.f32 %v1500_v42, %v4094_v49  ;;  %v1503_v45 = vsub.f32 1.0, %v2658_v46  ;;  %v1505_v27 = vmul.f32 %v2658_v46, %v3780_v18 }
 0x634   :  { %2659 = vtanh.f32 %v1501_v47 }
 0x641   :  { %v2660_v25 = vpop.eup %2659 }
 0x642   :  { %v1504_v0 = vmul.f32 %v2660_v25, %v1503_v45 }
 0x644   :  { %v1506_v41 = vadd.f32 %v1505_v27, %v1504_v0  ;;  %v4105_v27 = vld [vmem:[#allocation43_spill] sm:$0xff] }
 0x646   :  { %v3859_v36 = vsel %vm1512_vm15, %v1506_v41, %v3780_v18 }
 0x647   :  { %1585 = vmatmul.mubr.f32.vlgmr.msra.gmra.mxu0 %v3859_v36  ;;  %2540 = vmatmul.mubr.f32.vlgmr.msra.gmra.mxu1 %v3859_v36 }
 0x648   :  { %1696 = vmatpush1.msra.mxu0 %v3532_v54  ;;  %2543 = vmatpush3.msra.mxu1 %v3666_v37  ;;  %v4095_v54 = vld [vmem:[#allocation20_spill] sm:$0xff] }
 0x649   :  { %1697 = vmatprep.subr.mxu0 %v3536_v50  ;;  %2544 = vmatprep.subr.mxu1 %v4049_v1  ;;  %v4096_v50 = vld [vmem:[#allocation19_spill] sm:$0xff] }
 0x64a   :  { %1698 = vmatpush1.msra.mxu0 %v3540_v3  ;;  %2545 = vmatpush3.msra.mxu1 %v3672_v52  ;;  %v4097_v3 = vld [vmem:[#allocation21_spill] sm:$0xff] }
 0x64b   :  { %1699 = vmatprep.subr.mxu0 %v3544_v62  ;;  %2546 = vmatprep.subr.mxu1 %v4049_v1  ;;  %v4098_v62 = vld [vmem:[#allocation28_spill] sm:$0xff] }
 0x64c   :  { %1700 = vmatpush1.msra.mxu0 %v3548_v21  ;;  %2547 = vmatpush3.msra.mxu1 %v3678_v56  ;;  %v4099_v21 = vld [vmem:[#allocation29_spill] sm:$0xff] }
 0x64d   :  { %1701 = vmatprep.subr.mxu0 %v3552_v48  ;;  %2548 = vmatprep.subr.mxu1 %v4049_v1 }
 0x64e   :  { %1702 = vmatpush1.msra.mxu0 %v3556_v15  ;;  %2549 = vmatpush3.msra.mxu1 %v3684_v8  ;;  %v1686_v8 = vpop.permute.xlu0 %1685 }
 0x64f   :  { %1703 = vmatprep.subr.mxu0 %v3560_v55  ;;  %2550 = vmatprep.subr.mxu1 %v4049_v1  ;;  %v4100_v55 = vld [vmem:[#allocation42_spill] sm:$0xff]  ;;  %vm1687_vm0 = vcmp.eq.s32.totalorder %v1686_v8, 1 }
 0x650   :  { %1704 = vmatpush1.msra.mxu0 %v3564_v39  ;;  %2551 = vmatpush3.msra.mxu1 %v3690_v9 }
 0x651   :  { %1705 = vmatprep.subr.mxu0 %v3568_v57  ;;  %2552 = vmatprep.subr.mxu1 %v4049_v1 }
 0x652   :  { %1706 = vmatpush1.msra.mxu0 %v3572_v51  ;;  %2553 = vmatpush3.msra.mxu1 %v3696_v20 }
 0x653   :  { %1707 = vmatprep.subr.mxu0 %v3576_v58  ;;  %2554 = vmatprep.subr.mxu1 %v4049_v1  ;;  %v4101_v58 = vld [vmem:[#allocation39_spill] sm:$0xff] }
 0x654   :  { %1708 = vmatpush1.msra.mxu0 %v3580_v6  ;;  %2555 = vmatpush3.msra.mxu1 %v3702_v33 }
 0x655   :  { %1709 = vmatprep.subr.mxu0 %v3584_v60  ;;  %2556 = vmatprep.subr.mxu1 %v4049_v1 }
 0x656   :  { %1710 = vmatpush1.msra.mxu0 %v3588_v44  ;;  %2557 = vmatpush3.msra.mxu1 %v3708_v12  ;;  %v1953_v12 = vld [vmem:[#allocation9] sm:$0x3f] }
 0x657   :  { %1711 = vmatprep.subr.mxu0 %v3592_v61  ;;  %2558 = vmatprep.subr.mxu1 %v4049_v1  ;;  %v4102_v61 = vld [vmem:[#allocation40_spill] sm:$0xff] }
 0x658   :  { %1712 = vmatpush1.msra.mxu0 %v3596_v19  ;;  %2559 = vmatpush3.msra.mxu1 %v3714_v13 }
 0x659   :  { %1713 = vmatprep.subr.mxu0 %v3600_v63  ;;  %2560 = vmatprep.subr.mxu1 %v4049_v1 }
 0x65a   :  { %1714 = vmatpush1.msra.mxu0 %v3604_v22  ;;  %2561 = vmatpush3.msra.mxu1 %v3720_v14  ;;  %v1866_v14 = vld [vmem:[%s3976_s7] sm:$0x3f] }
 0x65b   :  { %1715 = vmatprep.subr.mxu0 %v3608_v2  ;;  %2562 = vmatprep.subr.mxu1 %v4049_v1 }
 0x65c   :  { %1716 = vmatpush1.msra.mxu0 %v3612_v24  ;;  %2563 = vmatpush3.msra.mxu1 %v3726_v16  ;;  %v1952_v16 = vld [vmem:[%s3978_s9] sm:$0xff] }
 0x65d   :  { %1717 = vmatprep.subr.mxu0 %v3616_v4  ;;  %2564 = vmatprep.subr.mxu1 %v4049_v1 }
 0x65e   :  { %1718 = vmatpush1.msra.mxu0 %v3620_v26  ;;  %2565 = vmatpush3.msra.mxu1 %v3732_v30  ;;  %v1865_v30 = vld [vmem:[%s3975_s6] sm:$0xff]  ;;  %s2868_s6 = smov 16  }
 0x65f   :  { %1719 = vmatprep.subr.mxu0 %v3624_v5  ;;  %2566 = vmatprep.subr.mxu1 %v4049_v1 }
 0x660   :  { %1720 = vmatpush1.msra.mxu0 %v3628_v28  ;;  %2567 = vmatpush3.msra.mxu1 %v3738_v17 }
 0x661   :  { %1721 = vmatprep.subr.mxu0 %v3632_v7  ;;  %2568 = vmatprep.subr.mxu1 %v4049_v1  ;;  %v4103_v7 = vld [vmem:[#allocation49_spill] sm:$0xff] }
 0x662   :  { %1722 = vmatpush1.msra.mxu0 %v3636_v29  ;;  %2569 = vmatpush3.msra.mxu1 %v3744_v32 }
 0x663   :  { %1723 = vmatprep.subr.mxu0 %v3747_v34  ;;  %2570 = vmatprep.subr.mxu1 %v4049_v1 }
 0x664   :  { %1724 = vmatpush1.msra.mxu0 %v4095_v54  ;;  %2571 = vmatpush3.msra.mxu1 %v4096_v50 }
 0x665   :  { %1725 = vmatprep.subr.mxu0 %v4097_v3  ;;  %2572 = vmatprep.subr.mxu1 %v4049_v1 }
 0x666   :  { %1726 = vmatpush1.msra.mxu0 %v4098_v62  ;;  %1759 = vmatprep.mubr.f32.mxu0 %v4049_v1 }
 0x667   :  { %2573 = vmatpush3.msra.mxu1 %v4099_v21  ;;  %2574 = vmatprep.mubr.msk.f32.mxu1 %vm2867_vm5, %v4049_v1 }
 0x668   :  { %2582 = vmatprep.subr.mxu1 %v4049_v1  ;;  %2577 = vmatprep.subr.mxu0 %v4049_v1 }
 0x707   :  { %v1586_v48 = vpop.f32.mrf.mxu0  ;;  %v1657_v15 = vpop.f32.mrf.mxu1 }
 0x708   :  { %v1587_v39 = vadd.f32 %v1586_v48, %v4100_v55  ;;  %v1658_v26 = vadd.f32 %v1657_v15, %v3359_v59  ;;  %v4106_v48 = vld [vmem:[#allocation48_spill] sm:$0xff] }
 0x709   :  { %v1588_v57 = vpop.f32.mrf.mxu0  ;;  %v2541_v51 = vpop.f32.mrf.mxu1 }
 0x70a   :  { %v1661_v6 = vadd.f32 %v1587_v39, %v4101_v58  ;;  %v1589_v44 = vadd.f32 %v1588_v57, %v3344_v11  ;;  %v1861_v51 = vpop.permute.xlu1 %1860 }
 0x70b   :  { %vm1862_vm4 = vcmp.eq.s32.totalorder %v1861_v51, 1 }
 0x70c   :  { %v2115_v60 = vmul.f32 -1.442695, %v1661_v6  ;;  %v1668_v19 = vadd.f32 %v1589_v44, %v4102_v61 }
 0x70e   :  { %2661 = vpow2.f32 %v2115_v60  ;;  %v2116_v63 = vmul.f32 -1.442695, %v1668_v19 }
 0x710   :  { %2663 = vpow2.f32 %v2116_v63 }
 0x71b   :  { %v2662_v22 = vpop.eup %2661 }
 0x71c   :  { %v1665_v2 = vadd.f32 1.0, %v2662_v22 }
 0x71d   :  { %v2664_v24 = vpop.eup %2663 }
 0x71e   :  { %2665 = vrcp.f32 %v1665_v2  ;;  %v1672_v4 = vadd.f32 1.0, %v2664_v24 }
 0x720   :  { %2667 = vrcp.f32 %v1672_v4 }
 0x72b   :  { %v2666_v5 = vpop.eup %2665 }
 0x72c   :  { %v1675_v28 = vmul.f32 %v2666_v5, %v1658_v26 }
 0x72d   :  { %v2668_v37 = vpop.eup %2667 }
 0x72e   :  { %v1676_v29 = vadd.f32 %v1675_v28, %v4103_v7  ;;  %v1678_v52 = vsub.f32 1.0, %v2668_v37  ;;  %v1680_v20 = vmul.f32 %v2668_v37, %v3859_v36 }
 0x730   :  { %2669 = vtanh.f32 %v1676_v29 }
 0x73d   :  { %v2670_v56 = vpop.eup %2669 }
 0x73e   :  { %v1679_v9 = vmul.f32 %v2670_v56, %v1678_v52 }
 0x740   :  { %v1681_v33 = vadd.f32 %v1680_v20, %v1679_v9 }
 0x742   :  { %v1688_v13 = vsel %vm1687_vm0, %v1681_v33, %v3859_v36 }
 0x743   :  { %1760 = vmatmul.mubr.f32.vlgmr.msra.gmra.mxu0 %v1688_v13  ;;  %2575 = vmatmul.mubr.f32.vlgmr.msra.gmra.mxu1 %v1688_v13 }
 0x744   :  { %2583 = vmatpush3.msk.msra.mxu1 %vm1878_vm1, %v1953_v12  ;;  %2584 = vmatprep.mubr.msk.f32.mxu1 %vm2867_vm5, %v4049_v1 }
 0x745   :  { %2578 = vmatpush3.msk.msra.mxu0 %vm1878_vm1, %v1866_v14  ;;  %2579 = vmatprep.mubr.msk.f32.mxu0 %vm2867_vm5, %v4049_v1 }
 0x747   :  { %2585 = vmatmul.mubr.msk.f32.vlgmr.msra.gmra.mxu1 %vm1874_vm2, %v1952_v16  ;;  %2580 = vmatmul.mubr.msk.f32.vlgmr.msra.gmra.mxu0 %vm1874_vm2, %v1865_v30 }
 0x803   :  { %v1761_v17 = vpop.f32.mrf.mxu0  ;;  %v1832_v32 = vpop.f32.mrf.mxu1 }
 0x804   :  { %v1762_v34 = vadd.f32 %v1761_v17, %v4100_v55  ;;  %v1833_v3 = vadd.f32 %v1832_v32, %v3359_v59 }
 0x805   :  { %v1763_v18 = vpop.f32.mrf.mxu0  ;;  %v2576_v23 = vpop.f32.mrf.mxu1 }
 0x806   :  { %v1836_v42 = vadd.f32 %v1762_v34, %v4104_v31  ;;  %v1764_v43 = vadd.f32 %v1763_v18, %v3344_v11 }
 0x807   :  { %v2033_v53 = vpop.f32.mrf.mxu1  ;;  %v1948_v1 = vpop.f32.mrf.mxu0 }
 0x808   :  { %v2117_v40 = vmul.f32 -1.442695, %v1836_v42  ;;  %v2034_v49 = vadd.f32 %v2122_v10, %v2033_v53  ;;  %v1949_v47 = vadd.f32 %v2119_v35, %v1948_v1  ;;  %v1843_v38 = vadd.f32 %v1764_v43, %v4105_v27 }
 0x809   :  { %v2586_v46 = vpop.f32.mrf.mxu1  ;;  %v2581_v45 = vpop.f32.mrf.mxu0 }
 0x80a   :  { %2671 = vpow2.f32 %v2117_v40  ;;  %v2040_v25 = vmax.f32 %v2034_v49, 0.0  ;;  %v2037_v0 = vmax.f32 %v1949_v47, 0.0  ;;  %v2118_v41 = vmul.f32 -1.442695, %v1843_v38 }
 0x80c   :  { %2042 = vrot.lane.b32.xlu0 %v2040_v25, %s2868_s6  ;;  %2039 = vst.msk [vmem:[#allocation12] sm:$0xff] %vm2038_vm3, %v2037_v0  ;;  %2673 = vpow2.f32 %v2118_v41 }
 0x817   :  { %v2672_v36 = vpop.eup %2671 }
 0x818   :  { %v1840_v54 = vadd.f32 1.0, %v2672_v36 }
 0x819   :  { %v2674_v50 = vpop.eup %2673 }
 0x81a   :  { %2675 = vrcp.f32 %v1840_v54  ;;  %v1847_v11 = vadd.f32 1.0, %v2674_v50 }
 0x81c   :  { %2677 = vrcp.f32 %v1847_v11 }
 0x827   :  { %v2676_v62 = vpop.eup %2675 }
 0x828   :  { %v1850_v21 = vmul.f32 %v2676_v62, %v1833_v3 }
 0x829   :  { %v2678_v55 = vpop.eup %2677 }
 0x82a   :  { %v1851_v15 = vadd.f32 %v1850_v21, %v4106_v48  ;;  %v1853_v39 = vsub.f32 1.0, %v2678_v55  ;;  %v1855_v6 = vmul.f32 %v2678_v55, %v1688_v13 }
 0x82c   :  { %2679 = vtanh.f32 %v1851_v15 }
 0x839   :  { %v2680_v57 = vpop.eup %2679 }
 0x83a   :  { %v1854_v58 = vmul.f32 %v2680_v57, %v1853_v39 }
 0x83c   :  { %v1856_v60 = vadd.f32 %v1855_v6, %v1854_v58 }
 0x83e   :  { %v1863_v44 = vsel %vm1862_vm4, %v1856_v60, %v1688_v13 }
 0x83f   :  { %1864 = vst [vmem:[#allocation11] sm:$0xff] %v1863_v44 }
 0x840   :  { %2820 = shalt.err (!%p2817_p10)
}
 0x841   :  { %2056 = dma.vmem_to_hbm [thread:$0]  %s2054_s11, 128, %s3981_s12, [#allocation5]   ;;  %vm2045_vm5 = vcmask 261248  }
 0x842   :  { %s2870_s19 = smov [#allocation12]  }
 0x843   :  { %s2063_s20 = sshll.u32 %s2870_s19, 4  ;;  %s2064_s20 = int_to_ptr.vmem [resolvable:$true] %s2063_s20 }
 0x844   :  { %s2829_s21 = scalar_lea.vmem %s2064_s20, 128  ;;  %p2834_p12 = scmp.lt.s32.totalorder %s2064_s20, %s2064_s20 }
 0x845   :  { %p2830_p11 = scmp.ne.s32.totalorder %s2064_s20, %s2829_s21  ;;  %p2835_p13 = scmp.lt.s32.totalorder %s2829_s21, %s2829_s21 }
 0x847   :  { %p2836_p0 = por %p2835_p13, %p2834_p12 }
 0x849   :  { %p2837_p1 = pnand %p2836_p0, %p2830_p11 }
 0x87e   :  { %v2043_v59 = vpop.permute.xlu0 %2042 }
 0x87f   :  { %2046 = vst.msk [vmem:[#allocation12] sm:$0xff] %vm2045_vm5, %v2043_v59 }
 0x880   :  { %2840 = shalt.err (!%p2837_p1)
}
 0x881   :  { %2066 = dma.vmem_to_hbm [thread:$0]  %s2064_s20, 128, %s3982_s13, [#allocation13]  }
 0x882   :  { %2855 = dma.done.wait [#allocation5], 128  }
 0x883   :  { %2856 = vsyncadd [#allocation5], 4294967168 }
 0x884   :  { %2857 = dma.done.wait [#allocation13], 128  }
 0x885   :  { %2858 = vsyncadd [#allocation13], 4294967168 }
 0x886   :  { %2073 = vsyncpa [#allocation4], 1 }
 0x887   :  { %2074 = vsyncpa [#allocation7], 1 }
 0x888   :  { %2075 = vsyncpa [#allocation10], 1 }
 0x889   :  { %2076 = vsyncpa [#allocation5], 1 }
 0x88a   :  { %2077 = vsyncpa [#allocation13], 1 }

</bundles_post_ra>
